<compile_context>
chip_gen: v5e
topology: v5e:2x2
jax: 0.10.0
libtpu: 0.0.40
codegen_flags: <defaults>
</compile_context>

<pallas_src>
import functools

import jax
import jax.numpy as jnp
from jax.experimental import pallas as pl
from jax.experimental.pallas import tpu as pltpu


# ----------------------------------------------------------------------------
# Fused Transition_Block kernel
# ----------------------------------------------------------------------------

def _transition_kernel(x_ref, w1_ref, w2_ref, w3_ref, sb_ref, o_ref,
                       halo_e_ref, halo_o_ref, *,
                       T, Wo, c1, c2, mxu_dtype, approx_silu):
    """One (batch n, output-row-block rb) step of the whole Transition_Block.

    x_ref  : (2*T, Wo, 2*c1) input rows [2*rb*T, 2*rb*T + 2*T); W pre-split as
                             (Wo, column-parity) with parity folded into lanes.
    o_ref  : (T, Wo, 2*c2)   output rows [rb*T, rb*T + T); channels are
                             [cv3 branch | max-pool + cv1 branch].
    halo_* : (1, Wo, c2)     y2 (= cv2 output) of the last odd input row of the
                             previous row block (even / odd columns); rb axis is
                             'arbitrary', so this carry is sequentially safe.
    """
    rb = pl.program_id(1)
    f32 = jnp.float32
    cdt = mxu_dtype
    MT = T * Wo

    @pl.when(rb == 0)
    def _():  # top zero-padding row of the 3x3/s2 SAME conv
        halo_e_ref[...] = jnp.zeros_like(halo_e_ref)
        halo_o_ref[...] = jnp.zeros_like(halo_o_ref)

    prev_e = halo_e_ref[...]            # y2[2*rb*T - 1], even columns
    prev_o = halo_o_ref[...]            # y2[2*rb*T - 1], odd  columns

    sb = sb_ref[...]                    # (6, c2) stacked folded BN params
    s1, b1 = sb[0:1, :], sb[1:2, :]
    s2, b2 = sb[2:3, :], sb[3:4, :]
    s3, b3 = sb[4:5, :], sb[5:6, :]

    def silu(y):                        # y in f32
        if approx_silu:
            return y * pl.reciprocal(1.0 + jnp.exp(-y), approx=True)  # EUP slot
        return y * jax.nn.sigmoid(y)

    # ---- split the input slab once by row / column parity ------------------
    xr = x_ref[...].reshape(T, 2, Wo, 2 * c1)
    xe = xr[:, 0]                       # rows 2*ho     (T, Wo, 2*c1)
    xo = xr[:, 1]                       # rows 2*ho + 1
    x_ee, x_eo = xe[..., :c1], xe[..., c1:]   # even/odd columns
    x_oe, x_oo = xo[..., :c1], xo[..., c1:]

    # ---- cv2: 1x1 conv + folded BN + SiLU, per parity quarter --------------
    w2 = w2_ref[...].astype(cdt)

    def cv2q(q):                        # (T, Wo, c1) -> (T, Wo, c2) in cdt
        z = jnp.dot(q.reshape(MT, c1).astype(cdt), w2,
                    preferred_element_type=f32)
        z = silu(z * s2 + b2)
        return z.astype(cdt).reshape(T, Wo, c2)

    ee, eo = cv2q(x_ee), cv2q(x_eo)     # y2 even rows, even / odd cols
    oe, oo = cv2q(x_oe), cv2q(x_oo)     # y2 odd  rows, even / odd cols

    # carry this block's last odd y2 row to the next row block
    halo_e_ref[...] = oe[T - 1:T]
    halo_o_ref[...] = oo[T - 1:T]

    # y2 rows 2*ho - 1: previous block's halo row, then this block's odd rows
    if T > 1:
        pe = jnp.concatenate([prev_e, oe[:T - 1]], axis=0)
        po = jnp.concatenate([prev_o, oo[:T - 1]], axis=0)
    else:
        pe, po = prev_e, prev_o

    # column 2*wo - 1: odd-column slab shifted right by one (zero at wo == 0)
    zcol = jnp.zeros((T, 1, c2), cdt)

    def shiftw(a):
        # TODO(synk): pltpu.roll(a, 1, axis=1) + iota mask keeps this on the XLU.
        return jnp.concatenate([zcol, a[:, :Wo - 1]], axis=1)

    # ---- cv3: 3x3 / stride-2 conv as ONE fused MXU matmul (K = 9*c2) -------
    taps = jnp.concatenate(
        [shiftw(po), pe, po,            # ki = 0 : y2 row 2*ho - 1
         shiftw(eo), ee, eo,            # ki = 1 : y2 row 2*ho
         shiftw(oo), oe, oo],           # ki = 2 : y2 row 2*ho + 1
        axis=-1)                        # (T, Wo, 9*c2)
    y3 = jnp.dot(taps.reshape(MT, 9 * c2), w3_ref[...].astype(cdt),
                 preferred_element_type=f32)
    y3 = silu(y3 * s3 + b3)             # (MT, c2) f32

    # ---- branch 1: 2x2 max-pool + cv1 (1x1) + BN + SiLU --------------------
    mp = jnp.maximum(jnp.maximum(x_ee, x_eo), jnp.maximum(x_oe, x_oo))
    y1 = jnp.dot(mp.reshape(MT, c1).astype(cdt), w1_ref[...].astype(cdt),
                 preferred_element_type=f32)
    y1 = silu(y1 * s1 + b1)             # (MT, c2) f32

    # ---- single lane-dense store of the channel-concatenated tile ----------
    out = jnp.concatenate([y3.reshape(T, Wo, c2), y1.reshape(T, Wo, c2)],
                          axis=-1)
    o_ref[...] = out.astype(o_ref.dtype)


# ----------------------------------------------------------------------------
# Tile sizing (generation-aware, counts in-kernel temporaries)
# ----------------------------------------------------------------------------

def _vmem_capacity_bytes():
    try:
        return int(pltpu.get_tpu_info().vmem_capacity_bytes)
    except Exception:
        return 64 * 1024 * 1024            # conservative (v7x-sized) fallback


def _per_step_vmem_bytes(T, Wo, c1, c2, in_isz, out_isz, mxu_isz):
    mt = T * Wo
    io = (2 * (2 * T * Wo * 2 * c1) * in_isz      # double-buffered input slab
          + 2 * (T * Wo * 2 * c2) * out_isz)      # double-buffered output tile
    halo = 2 * Wo * c2 * mxu_isz
    temps = mt * (4 * c2 * mxu_isz                # four cv2 parity slabs
                  + 9 * c2 * mxu_isz              # fused 9-tap slab
                  + 2 * c2 * 4                    # cv3 / cv1 f32 results
                  + 2 * c2 * 4                    # BN/SiLU temps + output tile
                  + 2 * c1 * in_isz)              # pooled slab + parity splits
    return io + halo + temps


def _pick_row_block(Ho, Wo, c1, c2, in_isz, out_isz, mxu_isz, budget):
    best = 1
    for t in range(1, Ho + 1):
        if Ho % t:
            continue
        if _per_step_vmem_bytes(t, Wo, c1, c2, in_isz, out_isz, mxu_isz) <= budget:
            best = t
    return best


# ----------------------------------------------------------------------------
# pallas_call wrappers
# ----------------------------------------------------------------------------

def _transition_nhwc(x, params, row_block, mxu_dtype):
    N, H, W, c1 = x.shape
    assert H % 2 == 0 and W % 2 == 0, "Transition_Block needs even H, W"
    Ho, Wo = H // 2, W // 2
    c2 = params["w1"].shape[1]

    cap = _vmem_capacity_bytes()
    vmem_limit = max(32 * 1024 * 1024, min(cap * 3 // 4, 96 * 1024 * 1024))
    budget = int(vmem_limit * 0.8)
    mxu_isz = jnp.dtype(mxu_dtype).itemsize

    T = row_block if row_block is not None else _pick_row_block(
        Ho, Wo, c1, c2, x.dtype.itemsize, x.dtype.itemsize, mxu_isz, budget)
    assert Ho % T == 0, (Ho, T)

    # Free view: fold column parity into the lane dim so the stride-2 column
    # access of the conv / pool becomes a static lane slice inside the kernel.
    xv = x.reshape(N, H, Wo, 2 * c1)
    w3r = params["w3"].reshape(9 * c2, c2)                     # fused-K weight
    sb = jnp.concatenate([params["s1"], params["b1"],
                          params["s2"], params["b2"],
                          params["s3"], params["b3"]], axis=0)  # (6, c2)

    flops = (2 * N * H * W * c1 * c2            # cv2
             + 2 * N * Ho * Wo * 9 * c2 * c2    # cv3
             + 2 * N * Ho * Wo * c1 * c2)       # cv1
    transcendentals = N * H * W * c2 + 2 * N * Ho * Wo * c2
    bytes_accessed = (x.dtype.itemsize * N * H * W * c1
                      + x.dtype.itemsize * N * Ho * Wo * 2 * c2
                      + 4 * (2 * c1 * c2 + 9 * c2 * c2 + 6 * c2))

    kernel = functools.partial(
        _transition_kernel, T=T, Wo=Wo, c1=c1, c2=c2,
        mxu_dtype=mxu_dtype, approx_silu=(mxu_dtype != jnp.float32))

    return pl.pallas_call(
        kernel,
        out_shape=jax.ShapeDtypeStruct((N, Ho, Wo, 2 * c2), x.dtype),
        grid=(N, Ho // T),
        in_specs=[
            pl.BlockSpec((None, 2 * T, Wo, 2 * c1), lambda n, rb: (n, rb, 0, 0)),
            pl.BlockSpec((c1, c2), lambda n, rb: (0, 0)),          # w1
            pl.BlockSpec((c1, c2), lambda n, rb: (0, 0)),          # w2
            pl.BlockSpec((9 * c2, c2), lambda n, rb: (0, 0)),      # w3 (fused K)
            pl.BlockSpec((6, c2), lambda n, rb: (0, 0)),           # stacked BN
        ],
        out_specs=pl.BlockSpec((None, T, Wo, 2 * c2), lambda n, rb: (n, rb, 0, 0)),
        scratch_shapes=[
            pltpu.VMEM((1, Wo, c2), mxu_dtype),   # carried odd y2 row, even cols
            pltpu.VMEM((1, Wo, c2), mxu_dtype),   # carried odd y2 row, odd  cols
        ],
        compiler_params=pltpu.CompilerParams(
            dimension_semantics=("parallel", "arbitrary"),
            vmem_limit_bytes=int(vmem_limit)),
        cost_estimate=pl.CostEstimate(flops=flops,
                                      transcendentals=transcendentals,
                                      bytes_accessed=bytes_accessed),
    )(xv, params["w1"], params["w2"], w3r, sb)


@functools.partial(jax.jit, static_argnames=("row_block", "mxu_dtype"))
def transition_block_nhwc(x_nhwc, params, row_block=None, mxu_dtype=jnp.bfloat16):
    """NHWC-native entry point (no layout transposes)."""
    return _transition_nhwc(x_nhwc, params, row_block, mxu_dtype)


@functools.partial(jax.jit, static_argnames=("row_block", "mxu_dtype"))
def transition_block(x_nchw, params, row_block=None, mxu_dtype=jnp.bfloat16):
    """NCHW interface matching the PyTorch module."""
    # TODO(synk): keep NHWC end-to-end if the consumer allows it; these two
    # transposes are pure layout plumbing for the NCHW interface.
    x = jnp.transpose(x_nchw, (0, 2, 3, 1))              # NCHW -> NHWC
    out = _transition_nhwc(x, params, row_block, mxu_dtype)
    return jnp.transpose(out, (0, 3, 1, 2))              # NHWC -> NCHW


# ----------------------------------------------------------------------------
# Deterministic parameter construction (synthetic, mirrors module __init__)
# ----------------------------------------------------------------------------

def _fold_bn(key, c, eps=1e-3):
    k1, k2, k3, k4 = jax.random.split(key, 4)
    gamma = jax.random.uniform(k1, (c,), jnp.float32, 0.5, 1.5)
    beta = jax.random.normal(k2, (c,), jnp.float32) * 0.1
    mean = jax.random.normal(k3, (c,), jnp.float32) * 0.1
    var = jax.random.uniform(k4, (c,), jnp.float32, 0.5, 1.5)
    scale = gamma / jnp.sqrt(var + eps)
    bias = beta - mean * scale
    return scale.reshape(1, c), bias.reshape(1, c)


def make_params(key, c1, c2):
    ks = jax.random.split(key, 6)
    # cv1 / cv2: Conv2d(c1, c2, 1) weight (c2,c1,1,1) -> stored (c1, c2)
    w1 = jax.random.normal(ks[0], (c1, c2), jnp.float32) * 0.1
    w2 = jax.random.normal(ks[1], (c1, c2), jnp.float32) * 0.1
    # cv3: Conv2d(c2, c2, 3, 2, 1) weight (c2,c2,3,3) -> stored (9, c2_in, c2_out)
    w3 = jax.random.normal(ks[2], (9, c2, c2), jnp.float32) * 0.1
    s1, b1 = _fold_bn(ks[3], c2)
    s2, b2 = _fold_bn(ks[4], c2)
    s3, b3 = _fold_bn(ks[5], c2)
    return dict(w1=w1, w2=w2, w3=w3, s1=s1, b1=b1, s2=s2, b2=b2, s3=s3, b3=b3)


# ----------------------------------------------------------------------------
# Pure-JAX reference (eval-mode BN folded), for correctness checks
# ----------------------------------------------------------------------------

def reference_transition_block(x_nchw, P):
    x = jnp.transpose(x_nchw, (0, 2, 3, 1))
    c1 = x.shape[-1]
    c2 = P["w1"].shape[1]

    def conv_bn_silu(inp, w_hwio, scale, bias, stride, pad):
        y = jax.lax.conv_general_dilated(
            inp, w_hwio, window_strides=(stride, stride),
            padding=[(pad, pad), (pad, pad)],
            dimension_numbers=("NHWC", "HWIO", "NHWC"))
        y = y * scale + bias
        return y * jax.nn.sigmoid(y)

    xp = jax.lax.reduce_window(x, -jnp.inf, jax.lax.max,
                               (1, 2, 2, 1), (1, 2, 2, 1), "VALID")
    x1 = conv_bn_silu(xp, P["w1"].reshape(1, 1, c1, c2), P["s1"], P["b1"], 1, 0)
    x2 = conv_bn_silu(x, P["w2"].reshape(1, 1, c1, c2), P["s2"], P["b2"], 1, 0)
    x2 = conv_bn_silu(x2, P["w3"].reshape(3, 3, c2, c2), P["s3"], P["b3"], 2, 1)
    out = jnp.concatenate([x2, x1], axis=-1)
    return jnp.transpose(out, (0, 3, 1, 2))


# ----------------------------------------------------------------------------

if __name__ == "__main__":
    N, C1, H, W = 2, 4, 16, 16
    C2 = 4  # Transition_Block(c1, c2); output has 2*c2 channels

    root = jax.random.PRNGKey(0)
    kx, kp = jax.random.split(root)
    x = jax.random.normal(kx, (N, C1, H, W), jnp.float32)
    params = make_params(kp, C1, C2)

    ref = jax.block_until_ready(reference_transition_block(x, params))

    # f32 MXU path, multi row-block (exercises the odd-row halo carry), tight check
    out_f32 = jax.block_until_ready(
        transition_block(x, params, row_block=4, mxu_dtype=jnp.float32))
    assert out_f32.shape == (N, 2 * C2, H // 2, W // 2), out_f32.shape
    assert jnp.allclose(out_f32, ref, rtol=1e-4, atol=1e-4), (
        float(jnp.max(jnp.abs(out_f32 - ref))))

    # default bf16-MXU / f32-accumulation path, auto-selected row block
    out_bf16 = jax.block_until_ready(transition_block(x, params))
    assert out_bf16.shape == (N, 2 * C2, H // 2, W // 2), out_bf16.shape
    assert jnp.allclose(out_bf16, ref, rtol=1e-1, atol=5e-2), (
        float(jnp.max(jnp.abs(out_bf16 - ref))))

    print("KERNEL_OK")
</pallas_src>

<mosaic_0001>
module attributes {stable_mosaic.version = 11 : i64} {
  func.func @_transition_kernel(%arg0: i32, %arg1: i32, %arg2: memref<1x8x8x8xf32, #tpu.memory_space<vmem>>, %arg3: memref<4x4xf32, #tpu.memory_space<vmem>>, %arg4: memref<4x4xf32, #tpu.memory_space<vmem>>, %arg5: memref<36x4xf32, #tpu.memory_space<vmem>>, %arg6: memref<6x4xf32, #tpu.memory_space<vmem>>, %arg7: memref<1x4x8x8xf32, #tpu.memory_space<vmem>>, %arg8: memref<1x8x4xf32, #tpu.memory_space<vmem>>, %arg9: memref<1x8x4xf32, #tpu.memory_space<vmem>>) attributes {dimension_semantics = [#tpu.dimension_semantics<parallel>, #tpu.dimension_semantics<arbitrary>], iteration_bounds = array<i64: 2, 2>, scalar_prefetch = 0 : i64, scratch_operands = 2 : i64, tpu.core_type = #tpu.core_type<tc>, window_params = [{transform_indices = @transform_0, window_bounds = array<i64: 1, 8, 8, 8>}, {pipeline_mode = #tpu.pipeline_mode<synchronous>, transform_indices = @transform_1, window_bounds = array<i64: 4, 4>}, {pipeline_mode = #tpu.pipeline_mode<synchronous>, transform_indices = @transform_2, window_bounds = array<i64: 4, 4>}, {pipeline_mode = #tpu.pipeline_mode<synchronous>, transform_indices = @transform_3, window_bounds = array<i64: 36, 4>}, {pipeline_mode = #tpu.pipeline_mode<synchronous>, transform_indices = @transform_4, window_bounds = array<i64: 6, 4>}, {transform_indices = @transform_5, window_bounds = array<i64: 1, 4, 8, 8>}]} {
    %c0_i32 = arith.constant 0 : i32
    %0 = arith.cmpi eq, %arg1, %c0_i32 : i32
    %1 = arith.extui %0 : i1 to i32
    %c0_i32_0 = arith.constant 0 : i32
    %2 = arith.cmpi ne, %1, %c0_i32_0 : i32
    scf.if %2 {
      %cst_40 = arith.constant 0.000000e+00 : f32
      %127 = vector.broadcast %cst_40 : f32 to vector<1x8x4xf32>
      %c0_41 = arith.constant 0 : index
      %c0_42 = arith.constant 0 : index
      %c0_43 = arith.constant 0 : index
      %128 = vector.load %arg8[%c0_41, %c0_42, %c0_43] : memref<1x8x4xf32, #tpu.memory_space<vmem>>, vector<1x8x4xf32>
      tpu.vector_store %arg8[%c0_41, %c0_42, %c0_43], %127 {strides = array<i32>} : memref<1x8x4xf32, #tpu.memory_space<vmem>>, vector<1x8x4xf32>,
      %cst_44 = arith.constant 0.000000e+00 : f32
      %129 = vector.broadcast %cst_44 : f32 to vector<1x8x4xf32>
      %c0_45 = arith.constant 0 : index
      %c0_46 = arith.constant 0 : index
      %c0_47 = arith.constant 0 : index
      %130 = vector.load %arg9[%c0_45, %c0_46, %c0_47] : memref<1x8x4xf32, #tpu.memory_space<vmem>>, vector<1x8x4xf32>
      tpu.vector_store %arg9[%c0_45, %c0_46, %c0_47], %129 {strides = array<i32>} : memref<1x8x4xf32, #tpu.memory_space<vmem>>, vector<1x8x4xf32>,
    } else {
    }
    %c0 = arith.constant 0 : index
    %c0_1 = arith.constant 0 : index
    %c0_2 = arith.constant 0 : index
    %3 = vector.load %arg8[%c0, %c0_1, %c0_2] : memref<1x8x4xf32, #tpu.memory_space<vmem>>, vector<1x8x4xf32>
    %c0_3 = arith.constant 0 : index
    %c0_4 = arith.constant 0 : index
    %c0_5 = arith.constant 0 : index
    %4 = vector.load %arg9[%c0_3, %c0_4, %c0_5] : memref<1x8x4xf32, #tpu.memory_space<vmem>>, vector<1x8x4xf32>
    %c0_6 = arith.constant 0 : index
    %c0_7 = arith.constant 0 : index
    %5 = vector.load %arg6[%c0_6, %c0_7] : memref<6x4xf32, #tpu.memory_space<vmem>>, vector<6x4xf32>
    %6 = vector.extract_strided_slice %5 {offsets = [0, 0], sizes = [1, 4], strides = [1, 1]} : vector<6x4xf32> to vector<1x4xf32>
    %7 = vector.extract_strided_slice %5 {offsets = [1, 0], sizes = [1, 4], strides = [1, 1]} : vector<6x4xf32> to vector<1x4xf32>
    %8 = vector.extract_strided_slice %5 {offsets = [2, 0], sizes = [1, 4], strides = [1, 1]} : vector<6x4xf32> to vector<1x4xf32>
    %9 = vector.extract_strided_slice %5 {offsets = [3, 0], sizes = [1, 4], strides = [1, 1]} : vector<6x4xf32> to vector<1x4xf32>
    %10 = vector.extract_strided_slice %5 {offsets = [4, 0], sizes = [1, 4], strides = [1, 1]} : vector<6x4xf32> to vector<1x4xf32>
    %11 = vector.extract_strided_slice %5 {offsets = [5, 0], sizes = [1, 4], strides = [1, 1]} : vector<6x4xf32> to vector<1x4xf32>
    %c0_8 = arith.constant 0 : index
    %c0_9 = arith.constant 0 : index
    %c0_10 = arith.constant 0 : index
    %c0_11 = arith.constant 0 : index
    %12 = vector.load %arg2[%c0_8, %c0_9, %c0_10, %c0_11] : memref<1x8x8x8xf32, #tpu.memory_space<vmem>>, vector<1x8x8x8xf32>
    %13 = vector.shape_cast %12 : vector<1x8x8x8xf32> to vector<8x8x8xf32>
    %14 = vector.shape_cast %13 : vector<8x8x8xf32> to vector<4x2x8x8xf32>
    %15 = vector.extract_strided_slice %14 {offsets = [0, 0, 0, 0], sizes = [4, 1, 8, 8], strides = [1, 1, 1, 1]} : vector<4x2x8x8xf32> to vector<4x1x8x8xf32>
    %16 = vector.shape_cast %15 : vector<4x1x8x8xf32> to vector<4x8x8xf32>
    %17 = vector.extract_strided_slice %14 {offsets = [0, 1, 0, 0], sizes = [4, 1, 8, 8], strides = [1, 1, 1, 1]} : vector<4x2x8x8xf32> to vector<4x1x8x8xf32>
    %18 = vector.shape_cast %17 : vector<4x1x8x8xf32> to vector<4x8x8xf32>
    %19 = vector.extract_strided_slice %16 {offsets = [0, 0, 0], sizes = [4, 8, 4], strides = [1, 1, 1]} : vector<4x8x8xf32> to vector<4x8x4xf32>
    %20 = vector.extract_strided_slice %16 {offsets = [0, 0, 4], sizes = [4, 8, 4], strides = [1, 1, 1]} : vector<4x8x8xf32> to vector<4x8x4xf32>
    %21 = vector.extract_strided_slice %18 {offsets = [0, 0, 0], sizes = [4, 8, 4], strides = [1, 1, 1]} : vector<4x8x8xf32> to vector<4x8x4xf32>
    %22 = vector.extract_strided_slice %18 {offsets = [0, 0, 4], sizes = [4, 8, 4], strides = [1, 1, 1]} : vector<4x8x8xf32> to vector<4x8x4xf32>
    %c0_12 = arith.constant 0 : index
    %c0_13 = arith.constant 0 : index
    %23 = vector.load %arg4[%c0_12, %c0_13] : memref<4x4xf32, #tpu.memory_space<vmem>>, vector<4x4xf32>
    %24 = vector.shape_cast %19 : vector<4x8x4xf32> to vector<32x4xf32>
    %cst = arith.constant dense<0.000000e+00> : vector<32x4xf32>
    %25 = tpu.matmul %24, %23, %cst {dimension_numbers = #tpu.dot_dimension_numbers<[1], [0], [0], [1], [0, 0, 1, 1], [], []>} : vector<32x4xf32>, vector<4x4xf32>, vector<32x4xf32> -> vector<32x4xf32>
    %26 = vector.broadcast %8 : vector<1x4xf32> to vector<32x4xf32>
    %27 = arith.mulf %25, %26 : vector<32x4xf32>
    %28 = vector.broadcast %9 : vector<1x4xf32> to vector<32x4xf32>
    %29 = arith.addf %27, %28 : vector<32x4xf32>
    %30 = arith.negf %29 : vector<32x4xf32>
    %31 = math.exp %30 : vector<32x4xf32>
    %cst_14 = arith.constant 1.000000e+00 : f32
    %32 = vector.broadcast %cst_14 : f32 to vector<32x4xf32>
    %33 = arith.addf %32, %31 : vector<32x4xf32>
    %34 = arith.divf %32, %33 : vector<32x4xf32>
    %35 = arith.mulf %29, %34 : vector<32x4xf32>
    %36 = vector.shape_cast %35 : vector<32x4xf32> to vector<4x8x4xf32>
    %37 = vector.shape_cast %20 : vector<4x8x4xf32> to vector<32x4xf32>
    %cst_15 = arith.constant dense<0.000000e+00> : vector<32x4xf32>
    %38 = tpu.matmul %37, %23, %cst_15 {dimension_numbers = #tpu.dot_dimension_numbers<[1], [0], [0], [1], [0, 0, 1, 1], [], []>} : vector<32x4xf32>, vector<4x4xf32>, vector<32x4xf32> -> vector<32x4xf32>
    %39 = vector.broadcast %8 : vector<1x4xf32> to vector<32x4xf32>
    %40 = arith.mulf %38, %39 : vector<32x4xf32>
    %41 = vector.broadcast %9 : vector<1x4xf32> to vector<32x4xf32>
    %42 = arith.addf %40, %41 : vector<32x4xf32>
    %43 = arith.negf %42 : vector<32x4xf32>
    %44 = math.exp %43 : vector<32x4xf32>
    %cst_16 = arith.constant 1.000000e+00 : f32
    %45 = vector.broadcast %cst_16 : f32 to vector<32x4xf32>
    %46 = arith.addf %45, %44 : vector<32x4xf32>
    %47 = arith.divf %45, %46 : vector<32x4xf32>
    %48 = arith.mulf %42, %47 : vector<32x4xf32>
    %49 = vector.shape_cast %48 : vector<32x4xf32> to vector<4x8x4xf32>
    %50 = vector.shape_cast %21 : vector<4x8x4xf32> to vector<32x4xf32>
    %cst_17 = arith.constant dense<0.000000e+00> : vector<32x4xf32>
    %51 = tpu.matmul %50, %23, %cst_17 {dimension_numbers = #tpu.dot_dimension_numbers<[1], [0], [0], [1], [0, 0, 1, 1], [], []>} : vector<32x4xf32>, vector<4x4xf32>, vector<32x4xf32> -> vector<32x4xf32>
    %52 = vector.broadcast %8 : vector<1x4xf32> to vector<32x4xf32>
    %53 = arith.mulf %51, %52 : vector<32x4xf32>
    %54 = vector.broadcast %9 : vector<1x4xf32> to vector<32x4xf32>
    %55 = arith.addf %53, %54 : vector<32x4xf32>
    %56 = arith.negf %55 : vector<32x4xf32>
    %57 = math.exp %56 : vector<32x4xf32>
    %cst_18 = arith.constant 1.000000e+00 : f32
    %58 = vector.broadcast %cst_18 : f32 to vector<32x4xf32>
    %59 = arith.addf %58, %57 : vector<32x4xf32>
    %60 = arith.divf %58, %59 : vector<32x4xf32>
    %61 = arith.mulf %55, %60 : vector<32x4xf32>
    %62 = vector.shape_cast %61 : vector<32x4xf32> to vector<4x8x4xf32>
    %63 = vector.shape_cast %22 : vector<4x8x4xf32> to vector<32x4xf32>
    %cst_19 = arith.constant dense<0.000000e+00> : vector<32x4xf32>
    %64 = tpu.matmul %63, %23, %cst_19 {dimension_numbers = #tpu.dot_dimension_numbers<[1], [0], [0], [1], [0, 0, 1, 1], [], []>} : vector<32x4xf32>, vector<4x4xf32>, vector<32x4xf32> -> vector<32x4xf32>
    %65 = vector.broadcast %8 : vector<1x4xf32> to vector<32x4xf32>
    %66 = arith.mulf %64, %65 : vector<32x4xf32>
    %67 = vector.broadcast %9 : vector<1x4xf32> to vector<32x4xf32>
    %68 = arith.addf %66, %67 : vector<32x4xf32>
    %69 = arith.negf %68 : vector<32x4xf32>
    %70 = math.exp %69 : vector<32x4xf32>
    %cst_20 = arith.constant 1.000000e+00 : f32
    %71 = vector.broadcast %cst_20 : f32 to vector<32x4xf32>
    %72 = arith.addf %71, %70 : vector<32x4xf32>
    %73 = arith.divf %71, %72 : vector<32x4xf32>
    %74 = arith.mulf %68, %73 : vector<32x4xf32>
    %75 = vector.shape_cast %74 : vector<32x4xf32> to vector<4x8x4xf32>
    %76 = vector.extract_strided_slice %62 {offsets = [3, 0, 0], sizes = [1, 8, 4], strides = [1, 1, 1]} : vector<4x8x4xf32> to vector<1x8x4xf32>
    %c0_21 = arith.constant 0 : index
    %c0_22 = arith.constant 0 : index
    %c0_23 = arith.constant 0 : index
    %77 = vector.load %arg8[%c0_21, %c0_22, %c0_23] : memref<1x8x4xf32, #tpu.memory_space<vmem>>, vector<1x8x4xf32>
    tpu.vector_store %arg8[%c0_21, %c0_22, %c0_23], %76 {strides = array<i32>} : memref<1x8x4xf32, #tpu.memory_space<vmem>>, vector<1x8x4xf32>,
    %78 = vector.extract_strided_slice %75 {offsets = [3, 0, 0], sizes = [1, 8, 4], strides = [1, 1, 1]} : vector<4x8x4xf32> to vector<1x8x4xf32>
    %c0_24 = arith.constant 0 : index
    %c0_25 = arith.constant 0 : index
    %c0_26 = arith.constant 0 : index
    %79 = vector.load %arg9[%c0_24, %c0_25, %c0_26] : memref<1x8x4xf32, #tpu.memory_space<vmem>>, vector<1x8x4xf32>
    tpu.vector_store %arg9[%c0_24, %c0_25, %c0_26], %78 {strides = array<i32>} : memref<1x8x4xf32, #tpu.memory_space<vmem>>, vector<1x8x4xf32>,
    %80 = vector.extract_strided_slice %62 {offsets = [0, 0, 0], sizes = [3, 8, 4], strides = [1, 1, 1]} : vector<4x8x4xf32> to vector<3x8x4xf32>
    %81 = tpu.concatenate %3, %80 in 0 : vector<1x8x4xf32>, vector<3x8x4xf32> -> vector<4x8x4xf32>
    %82 = vector.extract_strided_slice %75 {offsets = [0, 0, 0], sizes = [3, 8, 4], strides = [1, 1, 1]} : vector<4x8x4xf32> to vector<3x8x4xf32>
    %83 = tpu.concatenate %4, %82 in 0 : vector<1x8x4xf32>, vector<3x8x4xf32> -> vector<4x8x4xf32>
    %cst_27 = arith.constant 0.000000e+00 : f32
    %84 = vector.broadcast %cst_27 : f32 to vector<4x1x4xf32>
    %85 = vector.extract_strided_slice %83 {offsets = [0, 0, 0], sizes = [4, 7, 4], strides = [1, 1, 1]} : vector<4x8x4xf32> to vector<4x7x4xf32>
    %86 = tpu.concatenate %84, %85 in 1 : vector<4x1x4xf32>, vector<4x7x4xf32> -> vector<4x8x4xf32>
    %87 = vector.extract_strided_slice %49 {offsets = [0, 0, 0], sizes = [4, 7, 4], strides = [1, 1, 1]} : vector<4x8x4xf32> to vector<4x7x4xf32>
    %88 = tpu.concatenate %84, %87 in 1 : vector<4x1x4xf32>, vector<4x7x4xf32> -> vector<4x8x4xf32>
    %89 = vector.extract_strided_slice %75 {offsets = [0, 0, 0], sizes = [4, 7, 4], strides = [1, 1, 1]} : vector<4x8x4xf32> to vector<4x7x4xf32>
    %90 = tpu.concatenate %84, %89 in 1 : vector<4x1x4xf32>, vector<4x7x4xf32> -> vector<4x8x4xf32>
    %91 = tpu.concatenate %86, %81, %83, %88, %36, %49, %90, %62, %75 in 2 : vector<4x8x4xf32>, vector<4x8x4xf32>, vector<4x8x4xf32>, vector<4x8x4xf32>, vector<4x8x4xf32>, vector<4x8x4xf32>, vector<4x8x4xf32>, vector<4x8x4xf32>, vector<4x8x4xf32> -> vector<4x8x36xf32>
    %92 = vector.shape_cast %91 : vector<4x8x36xf32> to vector<32x36xf32>
    %c0_28 = arith.constant 0 : index
    %c0_29 = arith.constant 0 : index
    %93 = vector.load %arg5[%c0_28, %c0_29] : memref<36x4xf32, #tpu.memory_space<vmem>>, vector<36x4xf32>
    %cst_30 = arith.constant dense<0.000000e+00> : vector<32x4xf32>
    %94 = tpu.matmul %92, %93, %cst_30 {dimension_numbers = #tpu.dot_dimension_numbers<[1], [0], [0], [1], [0, 0, 1, 1], [], []>} : vector<32x36xf32>, vector<36x4xf32>, vector<32x4xf32> -> vector<32x4xf32>
    %95 = vector.broadcast %10 : vector<1x4xf32> to vector<32x4xf32>
    %96 = arith.mulf %94, %95 : vector<32x4xf32>
    %97 = vector.broadcast %11 : vector<1x4xf32> to vector<32x4xf32>
    %98 = arith.addf %96, %97 : vector<32x4xf32>
    %99 = arith.negf %98 : vector<32x4xf32>
    %100 = math.exp %99 : vector<32x4xf32>
    %cst_31 = arith.constant 1.000000e+00 : f32
    %101 = vector.broadcast %cst_31 : f32 to vector<32x4xf32>
    %102 = arith.addf %101, %100 : vector<32x4xf32>
    %103 = arith.divf %101, %102 : vector<32x4xf32>
    %104 = arith.mulf %98, %103 : vector<32x4xf32>
    %105 = arith.maximumf %19, %20 : vector<4x8x4xf32>
    %106 = arith.maximumf %21, %22 : vector<4x8x4xf32>
    %107 = arith.maximumf %105, %106 : vector<4x8x4xf32>
    %108 = vector.shape_cast %107 : vector<4x8x4xf32> to vector<32x4xf32>
    %c0_32 = arith.constant 0 : index
    %c0_33 = arith.constant 0 : index
    %109 = vector.load %arg3[%c0_32, %c0_33] : memref<4x4xf32, #tpu.memory_space<vmem>>, vector<4x4xf32>
    %cst_34 = arith.constant dense<0.000000e+00> : vector<32x4xf32>
    %110 = tpu.matmul %108, %109, %cst_34 {dimension_numbers = #tpu.dot_dimension_numbers<[1], [0], [0], [1], [0, 0, 1, 1], [], []>} : vector<32x4xf32>, vector<4x4xf32>, vector<32x4xf32> -> vector<32x4xf32>
    %111 = vector.broadcast %6 : vector<1x4xf32> to vector<32x4xf32>
    %112 = arith.mulf %110, %111 : vector<32x4xf32>
    %113 = vector.broadcast %7 : vector<1x4xf32> to vector<32x4xf32>
    %114 = arith.addf %112, %113 : vector<32x4xf32>
    %115 = arith.negf %114 : vector<32x4xf32>
    %116 = math.exp %115 : vector<32x4xf32>
    %cst_35 = arith.constant 1.000000e+00 : f32
    %117 = vector.broadcast %cst_35 : f32 to vector<32x4xf32>
    %118 = arith.addf %117, %116 : vector<32x4xf32>
    %119 = arith.divf %117, %118 : vector<32x4xf32>
    %120 = arith.mulf %114, %119 : vector<32x4xf32>
    %121 = vector.shape_cast %104 : vector<32x4xf32> to vector<4x8x4xf32>
    %122 = vector.shape_cast %120 : vector<32x4xf32> to vector<4x8x4xf32>
    %123 = tpu.concatenate %121, %122 in 2 : vector<4x8x4xf32>, vector<4x8x4xf32> -> vector<4x8x8xf32>
    %c0_36 = arith.constant 0 : index
    %c0_37 = arith.constant 0 : index
    %c0_38 = arith.constant 0 : index
    %c0_39 = arith.constant 0 : index
    %124 = vector.load %arg7[%c0_36, %c0_37, %c0_38, %c0_39] : memref<1x4x8x8xf32, #tpu.memory_space<vmem>>, vector<1x4x8x8xf32>
    %125 = vector.shape_cast %124 : vector<1x4x8x8xf32> to vector<4x8x8xf32>
    %126 = vector.shape_cast %123 : vector<4x8x8xf32> to vector<1x4x8x8xf32>
    tpu.vector_store %arg7[%c0_36, %c0_37, %c0_38, %c0_39], %126 {strides = array<i32>} : memref<1x4x8x8xf32, #tpu.memory_space<vmem>>, vector<1x4x8x8xf32>,
    return
  }
  func.func @transform_0(%arg0: i32, %arg1: i32) -> (i32, i32, i32, i32) {
    %c0_i32 = arith.constant 0 : i32
    %c0_i32_0 = arith.constant 0 : i32
    %c0_i32_1 = arith.constant 0 : i32
    return %arg0, %arg1, %c0_i32, %c0_i32_0 : i32, i32, i32, i32
  }
  func.func @transform_1(%arg0: i32, %arg1: i32) -> (i32, i32) {
    %c0_i32 = arith.constant 0 : i32
    %c0_i32_0 = arith.constant 0 : i32
    %c0_i32_1 = arith.constant 0 : i32
    return %c0_i32, %c0_i32_0 : i32, i32
  }
  func.func @transform_2(%arg0: i32, %arg1: i32) -> (i32, i32) {
    %c0_i32 = arith.constant 0 : i32
    %c0_i32_0 = arith.constant 0 : i32
    %c0_i32_1 = arith.constant 0 : i32
    return %c0_i32, %c0_i32_0 : i32, i32
  }
  func.func @transform_3(%arg0: i32, %arg1: i32) -> (i32, i32) {
    %c0_i32 = arith.constant 0 : i32
    %c0_i32_0 = arith.constant 0 : i32
    %c0_i32_1 = arith.constant 0 : i32
    return %c0_i32, %c0_i32_0 : i32, i32
  }
  func.func @transform_4(%arg0: i32, %arg1: i32) -> (i32, i32) {
    %c0_i32 = arith.constant 0 : i32
    %c0_i32_0 = arith.constant 0 : i32
    %c0_i32_1 = arith.constant 0 : i32
    return %c0_i32, %c0_i32_0 : i32, i32
  }
  func.func @transform_5(%arg0: i32, %arg1: i32) -> (i32, i32, i32, i32) {
    %c0_i32 = arith.constant 0 : i32
    %c0_i32_0 = arith.constant 0 : i32
    %c0_i32_1 = arith.constant 0 : i32
    return %arg0, %arg1, %c0_i32, %c0_i32_0 : i32, i32, i32, i32
  }
}

</mosaic_0001>

<bundles_post_ra>
// kernel: transition_block.1
= control target key start
LH: loop header
LB: loop body
LE: loop exit
PB: predicated region body
PF: predicated region fallthrough
CT: control target
= control target key end

     0   :  { %s1711_s18 = smov 0   ;;  %s1713_s19 = smov 0   ;;  %s2440_s0 = inlined_call_operand.vmem [shape: f32[2,16,8,8], index: 0, kind: input, shape index: {}]   ;;  %s2441_s1 = inlined_call_operand.vmem [shape: f32[4,4], index: 1, kind: input, shape index: {}]   ;;  %s2442_s2 = inlined_call_operand.vmem [shape: f32[4,4], index: 2, kind: input, shape index: {}]   ;;  %s2443_s3 = inlined_call_operand.vmem [shape: f32[36,4], index: 3, kind: input, shape index: {}]   ;;  %s2444_s4 = inlined_call_operand.vmem [shape: f32[6,4], index: 4, kind: input, shape index: {}]   ;;  %s2445_s5 = inlined_call_operand.vmem [shape: f32[2,8,8,8], index: 5, kind: output, shape index: {}]  }
   0x1   :  { %s1715_s20 = smov 0   ;;  %s1717_s21 = smov 0  }
   0x2   :  { %s1719_s22 = smov 0  }
   0x3 LB: > { %s24_s23 = sadd.s32 1, %s1661_s20  ;;  %s27_s24 = sadd.s32 1, %s1665_s21  ;;  %s1669_s22 = sphi %s1719_s22, %s15_s22   ;;  %s1665_s21 = sphi %s1717_s21, %s2481_s21   ;;  %s1661_s20 = sphi %s1715_s20, %s2480_s20   ;;  %s1657_s19 = sphi %s1713_s19, %s2479_s19   ;;  %s1653_s18 = sphi %s1711_s18, %s2478_s18  }
   0x4   : > { %p25_p0 = scmp.ge.s32.totalorder %s24_s23, 2  ;;  %p1418_p1 = scmp.ge.s32.totalorder %s1669_s22, 1 }
   0x5   : > { %p208_p2 = scmp.lt.s32.totalorder %s1669_s22, 5 }
   0x6   : > { %s2483_s23 = smov (%p25_p0, %s24_s23), 0  ;;  %s2485_s24 = smov (!%p25_p0, %s27_s24), %s1665_s21 }
   0x7   : > { %p209_p3 = pnand %p1418_p1, %p208_p2  ;;  %p29_p4 = scmp.ge.s32.totalorder %s2485_s24, 2 }
   0x8   : > { %s1419_s25 = sshll.u32 (!%p209_p3), %s1653_s18, 3  ;;  %p245_p5 = scmp.lt.s32.totalorder (!%p209_p3), %s1657_s19, 1 }
   0x9   : > { %s2487_s24 = smov (%p29_p4, %s2485_s24), 0  ;;  %212 = sbr.rel (%p209_p3) target bundleno = 644 (0x284), region = 40 }
   0xa   : > { %p247_p6 = scmp.lt.s32.totalorder (!%p209_p3), %s1419_s25, 15  ;;  %s1422_s26 = sshll.u32 (!%p209_p3), %s1653_s18, 2 }
   0xb   : > { %p257_p7 = scmp.lt.s32.totalorder (!%p209_p3), %s1422_s26, 7  ;;  %p1425_p8 = scmp.ne.s32.totalorder (!%p209_p3), %s1653_s18, 0 }
   0xe   : > { %s2489_s19 = smov (!%p245_p5, %s1657_s19), 1  ;;  %s2491_s25 = smov (!%p247_p6, %s1419_s25), 15 }
   0xf   : > { %s1420_s27 = sshll.u32 %s2489_s19, 4  ;;  %s1423_s8 = sshll.u32 %s2489_s19, 3 }
  0x10   : > { %s250_s28 = sadd.s32 %s1420_s27, %s2491_s25  ;;  %s2493_s26 = smov (!%p257_p7, %s1422_s26), 7 }
  0x11   : > { %s1421_s29 = sshll.u32 %s250_s28, 3  ;;  %s260_s9 = sadd.s32 %s1423_s8, %s2493_s26 }
  0x12   : > { %s1748_s7 = scalar_lea.vmem %s2440_s0, %s1421_s29  ;;  %s1424_s10 = sshll.u32 %s260_s9, 3 }
  0x13   : > { %s1753_s13 = scalar_lea.vmem %s2445_s5, %s1424_s10  ;;  %267 = sbr.rel (%p1425_p8) target bundleno = 27 (0x1b), region = 44 }
  0x18   : > { %vm268_vm0 = vcmask 31744   ;;  %v1671_v0 = vmov 0.0  }
  0x19   : > { %269 = vst.msk [vmem:[#allocation2] sm:$0xff] %vm268_vm0, %v1671_v0 }
  0x1a   : > { %270 = vst.msk [vmem:[#allocation3] sm:$0xff] %vm268_vm0, %v1671_v0 }
  0x1b PF: > { %v1757_v1 = vld [vmem:[%s1748_s7 + $0x20] sm:$0xff]  ;;  %v275_v2 = vld [vmem:[%s1748_s7 + $0x8] sm:$0xff]  ;;  %vm296_vm1 = vcmask 1043456   ;;  %s1672_s16 = smov 124   ;;  %vm283_vm2 = vcmask 31744   ;;  %v1771_v5 = vld [vmem:[%s1748_s7 + $0x18] sm:$0xff] }
  0x1c   : > { %v282_v3 = vld [vmem:[%s2442_s2] sm:$0xf]  ;;  %423 = vrot.lane.b32.xlu0 %v1757_v1, %s1672_s16  ;;  %681 = vrot.lane.b32.xlu1 %v275_v2, %s1672_s16  ;;  %v1778_v6 = vld [vmem:[%s1748_s7 + $0x30] sm:$0xff]  ;;  %s1673_s26 = smov 8   ;;  %s1674_s27 = smov 4  }
  0x1d   : > { %v274_v4 = vld [vmem:[%s1748_s7] sm:$0xff]  ;;  %1482 = vmatpush.msk.msra.mxu2 %vm296_vm1, %v282_v3  ;;  %1426 = vmatpush.msk.msra.mxu0 %vm296_vm1, %v282_v3  ;;  %v276_v7 = vld [vmem:[%s1748_s7 + $0x10] sm:$0xff]  ;;  %v1787_v8 = vld [vmem:[%s1748_s7 + $0x28] sm:$0xff]  ;;  %s1675_s28 = smov 16   ;;  %s1676_s29 = smov 28  }
  0x1e   : > { %1429 = vmatmul.msk.f32.vlgmr.msra.gmra.mxu2 %vm283_vm2, %v1757_v1  ;;  %1427 = vmatmul.msk.f32.vlgmr.msra.gmra.mxu0 %vm283_vm2, %v274_v4  ;;  %v1790_v9 = vld [vmem:[%s1748_s7 + $0x38] sm:$0xff]  ;;  %v1165_v10 = vld [vmem:[%s2441_s1] sm:$0xf]  ;;  %s1677_s30 = smov 20   ;;  %s1678_s6 = smov 12  }
  0x1f   : > { %1444 = vmatpush.msk.msrb.mxu2 %vm296_vm1, %v282_v3  ;;  %683 = vrot.lane.b32.xlu2 %v1771_v5, %s1672_s16  ;;  %v1814_v16 = vld [vmem:[%s2444_s4] sm:$0x3f]  ;;  %s1679_s7 = smov 32   ;;  %s1680_s8 = smov 24  }
  0x20   : > { %1483 = vmatpush.msk.msra.mxu3 %vm296_vm1, %v282_v3  ;;  %1435 = vmatpush.msk.msra.mxu1 %vm296_vm1, %v282_v3  ;;  %v1817_v17 = vperm.slane %v1814_v16, 2  ;;  %v1821_v20 = vperm.slane %v1814_v16, 3 }
  0x21   : > { %v1844_v38 = vld [vmem:[#allocation3] sm:$0xff] }
  0x22   : > { %1453 = vmatpush.msk.msrb.mxu3 %vm296_vm1, %v282_v3  ;;  %1471 = vmatpush.msk.msrb.mxu1 %vm296_vm1, %v1165_v10  ;;  %v271_v10 = vld [vmem:[#allocation2] sm:$0xff] }
  0x24   : > { %425 = vrot.lane.b32.xlu0 %v1778_v6, %s1672_s16  ;;  %419 = vrot.lane.b32.xlu1 %v274_v4, %s1672_s16 }
  0x26   : > { %1430 = vmatmul.msk.f32.gmra.mxu2 %vm283_vm2, %v1778_v6  ;;  %1428 = vmatmul.msk.f32.gmra.mxu0 %vm283_vm2, %v276_v7 }
  0x27   : > { %421 = vrot.lane.b32.xlu2 %v276_v7, %s1672_s16 }
  0x2c   : > { %685 = vrot.lane.b32.xlu0 %v1787_v8, %s1672_s16  ;;  %687 = vrot.lane.b32.xlu1 %v1790_v9, %s1672_s16 }
  0x2e   : > { %1445 = vmatmul.msk.f32.vlgmr.msrb.gmra.mxu2 %vm283_vm2, %v275_v2 }
  0x2f   : > { %857 = vrot.lane.b32.xlu2 %v271_v10, %s1674_s27 }
  0x34   : > { %869 = vrot.lane.b32.xlu0 %v1844_v38, %s1673_s26 }
  0x36   : > { %1446 = vmatmul.msk.f32.gmra.mxu2 %vm283_vm2, %v1771_v5 }
  0x3e   : > { %1447 = vmatmul.msk.f32.gmra.mxu2 %vm283_vm2, %v1787_v8 }
  0x46   : > { %1448 = vmatmul.msk.f32.gmra.mxu2 %vm283_vm2, %v1790_v9 }
  0x79   : > { %v684_v13 = vpop.permute.xlu2 %683 }
  0x7a   : > { %v1158_v35 = vmax.f32 %v1771_v5, %v684_v13 }
  0x81   : > { %v422_v21 = vpop.permute.xlu2 %421 }
  0x82   : > { %v1150_v36 = vmax.f32 %v276_v7, %v422_v21 }
  0x84   : > { %v1162_v40 = vmax.f32 %v1150_v36, %v1158_v35 }
  0x8e   : > { %v424_v11 = vpop.permute.xlu0 %423  ;;  %v682_v12 = vpop.permute.xlu1 %681 }
  0x8f   : > { %1438 = vmatmul.msk.f32.vlgmr.msra.gmra.mxu3 %vm283_vm2, %v424_v11  ;;  %v1157_v27 = vmax.f32 %v275_v2, %v682_v12  ;;  %v1151_v51 = vmax.f32 %v1757_v1, %v424_v11 }
  0x96   : > { %v1806_v14 = vpop.permute.xlu0 %425  ;;  %v420_v15 = vpop.permute.xlu1 %419 }
  0x97   : > { %1436 = vmatmul.msk.f32.vlgmr.msra.gmra.mxu1 %vm283_vm2, %v420_v15  ;;  %1439 = vmatmul.msk.f32.gmra.mxu3 %vm283_vm2, %v1806_v14  ;;  %v1149_v23 = vmax.f32 %v274_v4, %v420_v15  ;;  %v1152_v57 = vmax.f32 %v1778_v6, %v1806_v14 }
  0x99   : > { %v1161_v31 = vmax.f32 %v1149_v23, %v1157_v27 }
  0x9b   : > { %v317_v18 = vpop.f32.mrf.mxu0 }
  0x9c   : > { %v330_v19 = vmul.f32 %v1817_v17, %v317_v18 }
  0x9e   : > { %v1824_v22 = vadd.f32 %v1821_v20, %v330_v19  ;;  %v686_v42 = vpop.permute.xlu0 %685  ;;  %v688_v49 = vpop.permute.xlu1 %687 }
  0x9f   : > { %1437 = vmatmul.msk.f32.gmra.mxu1 %vm283_vm2, %v422_v21  ;;  %1454 = vmatmul.msk.f32.vlgmr.msrb.gmra.mxu3 %vm283_vm2, %v682_v12  ;;  %v1159_v46 = vmax.f32 %v1787_v8, %v686_v42  ;;  %v1160_v54 = vmax.f32 %v1790_v9, %v688_v49 }
  0xa0   : > { %v1431_v24 = vmul.f32 -1.442695, %v1824_v22 }
  0xa1   : > { %v323_v25 = vpop.f32.mrf.mxu2  ;;  %v1163_v53 = vmax.f32 %v1151_v51, %v1159_v46  ;;  %v1164_v62 = vmax.f32 %v1152_v57, %v1160_v54 }
  0xa2   : > { %v332_v26 = vmul.f32 %v1817_v17, %v323_v25  ;;  %1534 = vpow2.f32 %v1431_v24 }
  0xa3   : > { %v320_v28 = vpop.f32.mrf.mxu0 }
  0xa4   : > { %v1831_v29 = vadd.f32 %v1821_v20, %v332_v26  ;;  %v331_v30 = vmul.f32 %v1817_v17, %v320_v28 }
  0xa6   : > { %v1433_v32 = vmul.f32 -1.442695, %v1831_v29  ;;  %v1836_v33 = vadd.f32 %v1821_v20, %v331_v30 }
  0xa7   : > { %1455 = vmatmul.msk.f32.gmra.mxu3 %vm283_vm2, %v684_v13  ;;  %1472 = vmatmul.msk.f32.vlgmr.msrb.gmra.mxu1 %vm283_vm2, %v1161_v31 }
  0xa8   : > { %1536 = vpow2.f32 %v1433_v32  ;;  %v1432_v34 = vmul.f32 -1.442695, %v1836_v33  ;;  %v1535_v39 = vpop.eup %1534 }
  0xa9   : > { %v1842_v37 = vpop.f32.mrf.mxu2  ;;  %v1848_v43 = vadd.f32 1.0, %v1535_v39 }
  0xaa   : > { %1538 = vpow2.f32 %v1432_v34 }
  0xab   : > { %vm360_vm8 = vweird.f32 %v1848_v43  ;;  %v364_v13 = vand.u32 2147483647, %v1848_v43  ;;  %v366_v14 = vand.u32 2147483648, %v1848_v43 }
  0xad   : > { %vm365_vm14 = vcmp.eq.f32.partialorder %v364_v13, 8.507059e+37  ;;  %v367_v34 = vor.u32 1.1754944e-38, %v366_v14 }
  0xae   : > { %v1537_v41 = vpop.eup %1536 }
  0xaf   : > { %v353_v44 = vadd.f32 1.0, %v1537_v41  ;;  %1456 = vmatmul.msk.f32.gmra.mxu3 %vm283_vm2, %v686_v42  ;;  %1473 = vmatmul.msk.f32.gmra.mxu1 %vm283_vm2, %v1162_v40 }
  0xb0   : > { %v1539_v45 = vpop.eup %1538 }
  0xb1   : > { %1540 = vrcp.f32 %v353_v44  ;;  %v352_v47 = vadd.f32 1.0, %v1539_v45  ;;  %v581_v48 = vpop.f32.mrf.mxu2  ;;  %v396_v58 = vand.u32 2147483648, %v353_v44  ;;  %vm390_vm4 = vweird.f32 %v353_v44 }
  0xb2   : > { %1542 = vrcp.f32 %v1848_v43  ;;  %v593_v50 = vmul.f32 %v581_v48, %v1817_v17  ;;  %v394_v0 = vand.u32 2147483647, %v353_v44 }
  0xb3   : > { %1544 = vrcp.f32 %v352_v47  ;;  %vm375_vm3 = vweird.f32 %v352_v47  ;;  %v379_v4 = vand.u32 2147483647, %v352_v47  ;;  %v381_v5 = vand.u32 2147483648, %v352_v47 }
  0xb4   : > { %v1857_v52 = vadd.f32 %v593_v50, %v1821_v20  ;;  %v397_v6 = vor.u32 1.1754944e-38, %v396_v58  ;;  %vm395_vm12 = vcmp.eq.f32.partialorder %v394_v0, 8.507059e+37 }
  0xb5   : > { %vm1887_vm11 = vcmp.eq.f32.partialorder %v379_v4, 8.507059e+37  ;;  %v382_v27 = vor.u32 1.1754944e-38, %v381_v5 }
  0xb6   : > { %v1449_v55 = vmul.f32 -1.442695, %v1857_v52 }
  0xb7   : > { %v1541_v56 = vpop.eup %1540  ;;  %1457 = vmatmul.msk.f32.gmra.mxu3 %vm283_vm2, %v688_v49  ;;  %1474 = vmatmul.msk.f32.gmra.mxu1 %vm283_vm2, %v1163_v53 }
  0xb8   : > { %v1543_v59 = vpop.eup %1542  ;;  %1546 = vpow2.f32 %v1449_v55  ;;  %v386_v60 = vmul.f32 %v1541_v56, %v353_v44  ;;  %vm391_vm5 = vweird.f32 %v1541_v56 }
  0xb9   : > { %v1545_v61 = vpop.eup %1544  ;;  %v584_v63 = vpop.f32.mrf.mxu2  ;;  %v356_v11 = vmul.f32 %v1543_v59, %v1848_v43  ;;  %vm1871_vm7 = vmor %vm390_vm4, %vm391_vm5  ;;  %vm361_vm9 = vweird.f32 %v1543_v59 }
  0xba   : > { %v594_v1 = vmul.f32 %v584_v63, %v1817_v17  ;;  %v371_v2 = vmul.f32 %v1545_v61, %v352_v47  ;;  %v387_v3 = vsub.f32 1.0, %v386_v60  ;;  %vm376_vm6 = vweird.f32 %v1545_v61  ;;  %vm362_vm13 = vmor %vm360_vm8, %vm361_vm9 }
  0xbb   : > { %v357_v23 = vsub.f32 1.0, %v356_v11  ;;  %vm1883_vm10 = vmor %vm375_vm3, %vm376_vm6 }
  0xbc   : > { %v1867_v7 = vadd.f32 %v594_v1, %v1821_v20  ;;  %v372_v8 = vsub.f32 1.0, %v371_v2  ;;  %v388_v9 = vmul.f32 %v1541_v56, %v387_v3 }
  0xbd   : > { %v358_v31 = vmul.f32 %v1543_v59, %v357_v23 }
  0xbe   : > { %v1547_v15 = vpop.eup %1546  ;;  %v1450_v18 = vmul.f32 -1.442695, %v1867_v7  ;;  %v373_v19 = vmul.f32 %v1545_v61, %v372_v8  ;;  %v389_v21 = vadd.f32 %v1541_v56, %v388_v9 }
  0xbf   : > { %v613_v24 = vadd.f32 1.0, %v1547_v15  ;;  %1475 = vmatmul.msk.f32.gmra.mxu1 %vm283_vm2, %v1164_v62  ;;  %v359_v40 = vadd.f32 %v1543_v59, %v358_v31 }
  0xc0   : > { %1548 = vpow2.f32 %v1450_v18  ;;  %v374_v28 = vadd.f32 %v1545_v61, %v373_v19  ;;  %v393_v30 = vsel %vm1871_vm7, %v1541_v56, %v389_v21 }
  0xc1   : > { %1550 = vrcp.f32 %v613_v24  ;;  %v587_v32 = vpop.f32.mrf.mxu2  ;;  %v398_v36 = vsel %vm395_vm12, %v397_v6, %v393_v30  ;;  %v363_v43 = vsel %vm362_vm13, %v1543_v59, %v359_v40  ;;  %vm622_vm15 = vweird.f32 %v613_v24 }
  0xc2   : > { %v378_v35 = vsel %vm1883_vm10, %v1545_v61, %v374_v28  ;;  %v595_v39 = vmul.f32 %v587_v32, %v1817_v17  ;;  %v417_v42 = vmul.f32 %v398_v36, %v1831_v29  ;;  %v368_v46 = vsel %vm365_vm14, %v367_v34, %v363_v43 }
  0xc3   : > { %v383_v41 = vsel %vm1887_vm11, %v382_v27, %v378_v35  ;;  %v415_v49 = vmul.f32 %v368_v46, %v1824_v22  ;;  %v626_v54 = vand.u32 2147483647, %v613_v24  ;;  %v333_v28 = vmul.f32 %v1817_v17, %v1842_v37 }
  0xc4   : > { %v416_v44 = vmul.f32 %v383_v41, %v1836_v33  ;;  %v1904_v45 = vadd.f32 %v595_v39, %v1821_v20  ;;  %905 = vrot.lane.b32.xlu0 %v417_v42, %s1675_s28  ;;  %v628_v33 = vand.u32 2147483648, %v613_v24 }
  0xc5   : > { %901 = vrot.lane.b32.xlu2 %v415_v49, %s1675_s28  ;;  %vm627_vm4 = vcmp.eq.f32.partialorder %v626_v54, 8.507059e+37  ;;  %v1933_v34 = vadd.f32 %v1821_v20, %v333_v28 }
  0xc6   : > { %v1549_v47 = vpop.eup %1548  ;;  %903 = vrot.lane.b32.xlu1 %v416_v44, %s1675_s28  ;;  %v1451_v48 = vmul.f32 -1.442695, %v1904_v45  ;;  %v629_v56 = vor.u32 1.1754944e-38, %v628_v33 }
  0xc7   : > { %v1551_v50 = vpop.eup %1550  ;;  %v614_v51 = vadd.f32 1.0, %v1549_v47  ;;  %v1434_v41 = vmul.f32 -1.442695, %v1933_v34 }
  0xc8   : > { %v618_v29 = vmul.f32 %v1551_v50, %v613_v24  ;;  %1552 = vpow2.f32 %v1451_v48  ;;  %vm623_vm0 = vweird.f32 %v1551_v50 }
  0xc9   : > { %1554 = vrcp.f32 %v614_v51  ;;  %vm624_vm3 = vmor %vm622_vm15, %vm623_vm0  ;;  %vm637_vm5 = vweird.f32 %v614_v51  ;;  %v643_v63 = vand.u32 2147483648, %v614_v51  ;;  %v641_v2 = vand.u32 2147483647, %v614_v51 }
  0xca   : > { %v619_v53 = vsub.f32 1.0, %v618_v29  ;;  %vm828_vm0 = vcmask 1040384  }
  0xcb   : > { %v644_v4 = vor.u32 1.1754944e-38, %v643_v63  ;;  %vm642_vm8 = vcmp.eq.f32.partialorder %v641_v2, 8.507059e+37 }
  0xcc   : > { %v620_v55 = vmul.f32 %v1551_v50, %v619_v53 }
  0xce   : > { %v1553_v57 = vpop.eup %1552  ;;  %v621_v58 = vadd.f32 %v1551_v50, %v620_v55 }
  0xcf   : > { %v1555_v59 = vpop.eup %1554  ;;  %v615_v22 = vadd.f32 1.0, %v1553_v57 }
  0xd0   : > { %v625_v60 = vsel %vm624_vm3, %v1551_v50, %v621_v58  ;;  %v633_v61 = vmul.f32 %v1555_v59, %v614_v51  ;;  %vm638_vm6 = vweird.f32 %v1555_v59 }
  0xd1   : > { %v630_v62 = vsel %vm627_vm4, %v629_v56, %v625_v60  ;;  %1556 = vrcp.f32 %v615_v22  ;;  %vm639_vm7 = vmor %vm637_vm5, %vm638_vm6  ;;  %vm652_vm9 = vweird.f32 %v615_v22  ;;  %v658_v11 = vand.u32 2147483648, %v615_v22 }
  0xd2   : > { %v677_v0 = vmul.f32 %v630_v62, %v1857_v52  ;;  %v634_v1 = vsub.f32 1.0, %v633_v61  ;;  %v656_v13 = vand.u32 2147483647, %v615_v22  ;;  %v1957_v56 = vperm.slane %v1814_v16, 0 }
  0xd3   : > { %v659_v15 = vor.u32 1.1754944e-38, %v658_v11 }
  0xd4   : > { %859 = vrot.lane.b32.xlu1 %v677_v0, %s1674_s27  ;;  %v635_v3 = vmul.f32 %v1555_v59, %v634_v1  ;;  %942 = vrot.lane.b32.xlu2 %v677_v0, %s1676_s29  ;;  %vm657_vm12 = vcmp.eq.f32.partialorder %v656_v13, 8.507059e+37  ;;  %v1969_v1 = vperm.slane %v1814_v16, 1 }
  0xd6   : > { %v636_v5 = vadd.f32 %v1555_v59, %v635_v3 }
  0xd7   : > { %v1557_v6 = vpop.eup %1556 }
  0xd8   : > { %v640_v8 = vsel %vm639_vm7, %v1555_v59, %v636_v5  ;;  %v648_v9 = vmul.f32 %v1557_v6, %v615_v22  ;;  %vm653_vm10 = vweird.f32 %v1557_v6 }
  0xd9   : > { %v645_v10 = vsel %vm642_vm8, %v644_v4, %v640_v8  ;;  %vm654_vm11 = vmor %vm652_vm9, %vm653_vm10 }
  0xda   : > { %v678_v52 = vmul.f32 %v645_v10, %v1867_v7  ;;  %v649_v12 = vsub.f32 1.0, %v648_v9 }
  0xdc   : > { %861 = vrot.lane.b32.xlu0 %v678_v52, %s1674_s27  ;;  %v650_v14 = vmul.f32 %v1557_v6, %v649_v12  ;;  %944 = vrot.lane.b32.xlu1 %v678_v52, %s1676_s29 }
  0xde   : > { %v651_v18 = vadd.f32 %v1557_v6, %v650_v14 }
  0xe0   : > { %v655_v19 = vsel %vm654_vm11, %v1557_v6, %v651_v18 }
  0xe1   : > { %v660_v21 = vsel %vm657_vm12, %v659_v15, %v655_v19 }
  0xe2   : > { %v679_v23 = vmul.f32 %v660_v21, %v1904_v45 }
  0xe4   : > { %863 = vrot.lane.b32.xlu2 %v679_v23, %s1674_s27  ;;  %946 = vrot.lane.b32.xlu0 %v679_v23, %s1676_s29 }
 0x112   : > { %v458_v7 = vpop.f32.mrf.mxu3 }
 0x113   : > { %v466_v24 = vmul.f32 %v458_v7, %v1817_v17 }
 0x114   : > { %v452_v25 = vpop.f32.mrf.mxu1 }
 0x115   : > { %v1922_v26 = vadd.f32 %v466_v24, %v1821_v20  ;;  %v464_v27 = vmul.f32 %v452_v25, %v1817_v17 }
 0x117   : > { %v1442_v30 = vmul.f32 -1.442695, %v1922_v26  ;;  %v1929_v31 = vadd.f32 %v464_v27, %v1821_v20 }
 0x119   : > { %1558 = vpow2.f32 %v1442_v30  ;;  %v1440_v32 = vmul.f32 -1.442695, %v1929_v31 }
 0x11a   : > { %v461_v35 = vpop.f32.mrf.mxu3 }
 0x11b   : > { %1560 = vpow2.f32 %v1440_v32  ;;  %v467_v36 = vmul.f32 %v461_v35, %v1817_v17 }
 0x11c   : > { %v455_v39 = vpop.f32.mrf.mxu1 }
 0x11d   : > { %v1937_v40 = vadd.f32 %v467_v36, %v1821_v20  ;;  %v465_v37 = vmul.f32 %v455_v39, %v1817_v17 }
 0x11f   : > { %v1559_v42 = vpop.eup %1558  ;;  %v1443_v44 = vmul.f32 -1.442695, %v1937_v40  ;;  %v1943_v45 = vadd.f32 %v465_v37, %v1821_v20 }
 0x120   : > { %v1946_v47 = vadd.f32 1.0, %v1559_v42 }
 0x121   : > { %v1561_v43 = vpop.eup %1560  ;;  %1562 = vpow2.f32 %v1443_v44  ;;  %v1441_v46 = vmul.f32 -1.442695, %v1943_v45 }
 0x122   : > { %1564 = vpow2.f32 %v1434_v41  ;;  %v484_v48 = vadd.f32 1.0, %v1561_v43  ;;  %v714_v49 = vpop.f32.mrf.mxu3  ;;  %v529_v21 = vand.u32 2147483648, %v1946_v47  ;;  %v527_v30 = vand.u32 2147483647, %v1946_v47 }
 0x123   : > { %1566 = vpow2.f32 %v1441_v46  ;;  %v726_v50 = vmul.f32 %v714_v49, %v1817_v17  ;;  %vm523_vm4 = vweird.f32 %v1946_v47 }
 0x124   : > { %1568 = vrcp.f32 %v484_v48  ;;  %v1198_v51 = vpop.f32.mrf.mxu1  ;;  %v499_v12 = vand.u32 2147483648, %v484_v48  ;;  %v497_v14 = vand.u32 2147483647, %v484_v48  ;;  %vm493_vm14 = vweird.f32 %v484_v48 }
 0x125   : > { %v1950_v29 = vadd.f32 %v726_v50, %v1821_v20  ;;  %1570 = vrcp.f32 %v1946_v47  ;;  %v1211_v0 = vmul.f32 %v1957_v56, %v1198_v51  ;;  %v530_v44 = vor.u32 1.1754944e-38, %v529_v21 }
 0x126   : > { %v500_v28 = vor.u32 1.1754944e-38, %v499_v12  ;;  %vm498_vm3 = vcmp.eq.f32.partialorder %v497_v14, 8.507059e+37  ;;  %vm2015_vm5 = vcmp.eq.f32.partialorder %v527_v30, 8.507059e+37 }
 0x127   : > { %v1563_v33 = vpop.eup %1562  ;;  %v1458_v53 = vmul.f32 -1.442695, %v1950_v29  ;;  %v1984_v16 = vadd.f32 %v1969_v1, %v1211_v0 }
 0x128   : > { %v1565_v54 = vpop.eup %1564  ;;  %v1954_v55 = vadd.f32 1.0, %v1563_v33 }
 0x129   : > { %v1567_v57 = vpop.eup %1566  ;;  %1572 = vpow2.f32 %v1458_v53  ;;  %v1965_v63 = vadd.f32 1.0, %v1565_v54  ;;  %v1476_v7 = vmul.f32 -1.442695, %v1984_v16 }
 0x12a   : > { %v1569_v58 = vpop.eup %1568  ;;  %1574 = vrcp.f32 %v1954_v55  ;;  %v717_v59 = vpop.f32.mrf.mxu3  ;;  %v1960_v22 = vadd.f32 1.0, %v1567_v57  ;;  %v542_v51 = vand.u32 2147483647, %v1954_v55  ;;  %v544_v33 = vand.u32 2147483648, %v1954_v55 }
 0x12b   : > { %v727_v60 = vmul.f32 %v717_v59, %v1817_v17  ;;  %v489_v61 = vmul.f32 %v1569_v58, %v484_v48  ;;  %v1963_v62 = vpop.eup %1570  ;;  %vm494_vm13 = vweird.f32 %v1569_v58  ;;  %vm538_vm6 = vweird.f32 %v1954_v55 }
 0x12c   : > { %1576 = vrcp.f32 %v1960_v22  ;;  %v1201_v4 = vpop.f32.mrf.mxu1  ;;  %v519_v8 = vmul.f32 %v1963_v62, %v1946_v47  ;;  %vm495_vm15 = vmor %vm493_vm14, %vm494_vm13  ;;  %vm524_vm7 = vweird.f32 %v1963_v62  ;;  %v512_v59 = vand.u32 2147483647, %v1960_v22 }
 0x12d   : > { %v1973_v2 = vadd.f32 %v727_v60, %v1821_v20  ;;  %v490_v3 = vsub.f32 1.0, %v489_v61  ;;  %1578 = vrcp.f32 %v1965_v63  ;;  %vm2030_vm9 = vcmp.eq.f32.partialorder %v542_v51, 8.507059e+37  ;;  %vm2048_vm12 = vmor %vm523_vm4, %vm524_vm7 }
 0x12e   : > { %v520_v19 = vsub.f32 1.0, %v519_v8  ;;  %v545_v8 = vor.u32 1.1754944e-38, %v544_v33  ;;  %vm508_vm11 = vweird.f32 %v1960_v22  ;;  %vm2065_vm14 = vcmp.eq.f32.partialorder %v512_v59, 8.507059e+37 }
 0x12f   : > { %v1573_v5 = vpop.eup %1572  ;;  %v1459_v6 = vmul.f32 -1.442695, %v1973_v2  ;;  %v491_v11 = vmul.f32 %v1569_v58, %v490_v3 }
 0x130   : > { %v1978_v9 = vpop.eup %1574  ;;  %v1981_v10 = vadd.f32 1.0, %v1573_v5  ;;  %v521_v42 = vmul.f32 %v1963_v62, %v520_v19 }
 0x131   : > { %v534_v52 = vmul.f32 %v1978_v9, %v1954_v55  ;;  %1580 = vpow2.f32 %v1459_v6  ;;  %v492_v24 = vadd.f32 %v1569_v58, %v491_v11  ;;  %vm539_vm8 = vweird.f32 %v1978_v9 }
 0x132   : > { %1582 = vrcp.f32 %v1981_v10  ;;  %v720_v13 = vpop.f32.mrf.mxu3  ;;  %v1989_v15 = vpop.eup %1576  ;;  %v522_v60 = vadd.f32 %v1963_v62, %v521_v42  ;;  %v514_v11 = vand.u32 2147483648, %v1960_v22  ;;  %vm2056_vm13 = vmor %vm538_vm6, %vm539_vm8 }
 0x133   : > { %v728_v18 = vmul.f32 %v720_v13, %v1817_v17  ;;  %v535_v23 = vsub.f32 1.0, %v534_v52  ;;  %v504_v25 = vmul.f32 %v1989_v15, %v1960_v22  ;;  %v2000_v32 = vpop.eup %1578  ;;  %v496_v35 = vsel %vm495_vm15, %v1569_v58, %v492_v24 }
 0x134   : > { %v501_v41 = vsel %vm498_vm3, %v500_v28, %v496_v35  ;;  %1584 = vpow2.f32 %v1476_v7  ;;  %v1204_v49 = vpop.f32.mrf.mxu1  ;;  %v1212_v58 = vmul.f32 %v1957_v56, %v1201_v4  ;;  %vm509_vm10 = vweird.f32 %v1989_v15 }
 0x135   : > { %v1997_v27 = vadd.f32 %v728_v18, %v1821_v20  ;;  %v505_v36 = vsub.f32 1.0, %v504_v25  ;;  %v536_v46 = vmul.f32 %v1978_v9, %v535_v23  ;;  %v548_v50 = vmul.f32 %v501_v41, %v1929_v31  ;;  %vm2085_vm15 = vmor %vm508_vm11, %vm509_vm10 }
 0x136   : > { %v2061_v21 = vadd.f32 %v1969_v1, %v1212_v58  ;;  %v1213_v23 = vmul.f32 %v1957_v56, %v1204_v49  ;;  %v526_v55 = vsel %vm2048_vm12, %v1963_v62, %v522_v60  ;;  %vm755_vm3 = vweird.f32 %v1981_v10 }
 0x137   : > { %v1581_v39 = vpop.eup %1580  ;;  %v1460_v37 = vmul.f32 -1.442695, %v1997_v27  ;;  %913 = vrot.lane.b32.xlu0 %v548_v50, %s1677_s30  ;;  %v506_v57 = vmul.f32 %v1989_v15, %v505_v36  ;;  %v537_v61 = vadd.f32 %v1978_v9, %v536_v46  ;;  %v837_v5 = vrot.slane %v548_v50, 7 }
 0x138   : > { %v2005_v43 = vpop.eup %1582  ;;  %v2008_v48 = vadd.f32 1.0, %v1581_v39  ;;  %v515_v36 = vor.u32 1.1754944e-38, %v514_v11  ;;  %v590_v39 = vpop.f32.mrf.mxu2  ;;  %v761_v41 = vand.u32 2147483648, %v1981_v10  ;;  %v531_v42 = vsel %vm2015_vm5, %v530_v44, %v526_v55 }
 0x139   : > { %v751_v53 = vmul.f32 %v2005_v43, %v1981_v10  ;;  %1586 = vpow2.f32 %v1460_v37  ;;  %v845_v12 = vsel %vm828_vm0, 0.0, %v837_v5  ;;  %v507_v13 = vadd.f32 %v1989_v15, %v506_v57 }
 0x13a   : > { %1588 = vrcp.f32 %v2008_v48  ;;  %v723_v31 = vpop.f32.mrf.mxu3  ;;  %v2036_v4 = vpop.eup %1584  ;;  %885 = vrot.lane.b32.xlu1 %v845_v12, %s1678_s6  ;;  %v541_v24 = vsel %vm2056_vm13, %v1978_v9, %v537_v61  ;;  %v759_v37 = vand.u32 2147483647, %v1981_v10  ;;  %v2103_v50 = vadd.f32 %v1969_v1, %v1213_v23 }
 0x13b   : > { %v752_v0 = vsub.f32 1.0, %v751_v53  ;;  %v729_v3 = vmul.f32 %v723_v31, %v1817_v17  ;;  %v511_v9 = vsel %vm2085_vm15, %v1989_v15, %v507_v13  ;;  %v546_v46 = vsel %vm2030_vm9, %v545_v8, %v541_v24 }
 0x13c   : > { %v1207_v22 = vpop.f32.mrf.mxu1  ;;  %vm756_vm4 = vweird.f32 %v2005_v43  ;;  %v516_v51 = vsel %vm2065_vm14, %v515_v36, %v511_v9  ;;  %v596_v33 = vmul.f32 %v590_v39, %v1817_v17  ;;  %v550_v31 = vmul.f32 %v531_v42, %v1922_v26 }
 0x13d   : > { %v2039_v52 = vadd.f32 %v729_v3, %v1821_v20  ;;  %v753_v25 = vmul.f32 %v2005_v43, %v752_v0  ;;  %v1214_v44 = vmul.f32 %v1957_v56, %v1207_v22  ;;  %v549_v54 = vmul.f32 %v516_v51, %v1943_v45  ;;  %vm2126_vm6 = vmor %vm755_vm3, %vm756_vm4 }
 0x13e   : > { %v2115_v57 = vmul.f32 %v546_v46, %v1937_v40  ;;  %vm2117_vm5 = vcmp.eq.f32.partialorder %v759_v37, 8.507059e+37  ;;  %v762_v59 = vor.u32 1.1754944e-38, %v761_v41  ;;  %v2122_v60 = vadd.f32 %v596_v33, %v1821_v20 }
 0x13f   : > { %v1587_v18 = vpop.eup %1586  ;;  %v1461_v30 = vmul.f32 -1.442695, %v2039_v52  ;;  %v754_v15 = vadd.f32 %v2005_v43, %v753_v25  ;;  %v1478_v26 = vmul.f32 -1.442695, %v2103_v50  ;;  %915 = vrot.lane.b32.xlu2 %v549_v54, %s1677_s30  ;;  %v838_v40 = vrot.slane %v549_v54, 7 }
 0x140   : > { %v2072_v7 = vpop.eup %1588  ;;  %v2078_v28 = vadd.f32 1.0, %v1587_v18  ;;  %vm770_vm8 = vweird.f32 %v2008_v48  ;;  %v776_v10 = vand.u32 2147483648, %v2008_v48  ;;  %v1452_v61 = vmul.f32 -1.442695, %v2122_v60 }
 0x141   : > { %v766_v62 = vmul.f32 %v2072_v7, %v2008_v48  ;;  %vm771_vm7 = vweird.f32 %v2072_v7  ;;  %v758_v20 = vsel %vm2126_vm6, %v2005_v43, %v754_v15  ;;  %v774_v3 = vand.u32 2147483647, %v2008_v48 }
 0x142   : > { %1590 = vrcp.f32 %v2078_v28  ;;  %917 = vrot.lane.b32.xlu1 %v550_v31, %s1677_s30  ;;  %v2147_v6 = vadd.f32 %v1969_v1, %v1214_v44  ;;  %v846_v8 = vsel %vm828_vm0, 0.0, %v838_v40  ;;  %vm2152_vm9 = vmor %vm770_vm8, %vm771_vm7  ;;  %v839_v48 = vrot.slane %v550_v31, 7 }
 0x143   : > { %v767_v49 = vsub.f32 1.0, %v766_v62  ;;  %1592 = vpow2.f32 %v1461_v30  ;;  %887 = vrot.lane.b32.xlu0 %v846_v8, %s1678_s6  ;;  %v840_v12 = vrot.slane %v2115_v57, 7  ;;  %v763_v1 = vsel %vm2117_vm5, %v762_v59, %v758_v20 }
 0x144   : > { %1594 = vpow2.f32 %v1452_v61  ;;  %v1477_v14 = vmul.f32 -1.442695, %v2061_v21  ;;  %v2167_v18 = vadd.f32 1.0, %v2036_v4  ;;  %v777_v19 = vor.u32 1.1754944e-38, %v776_v10 }
 0x145   : > { %v768_v53 = vmul.f32 %v2072_v7, %v767_v49  ;;  %1596 = vpow2.f32 %v1478_v26  ;;  %vm775_vm10 = vcmp.eq.f32.partialorder %v774_v3, 8.507059e+37  ;;  %v1479_v47 = vmul.f32 -1.442695, %v2147_v6 }
 0x146   : > { %v810_v55 = vmul.f32 %v763_v1, %v1950_v29  ;;  %v847_v25 = vsel %vm828_vm0, 0.0, %v839_v48  ;;  %vm785_vm11 = vweird.f32 %v2078_v28  ;;  %v401_v37 = vmul.f32 %v2000_v32, %v1965_v63 }
 0x147   : > { %v769_v45 = vadd.f32 %v2072_v7, %v768_v53  ;;  %889 = vrot.lane.b32.xlu2 %v847_v25, %s1678_s6  ;;  %v789_v41 = vand.u32 2147483647, %v2078_v28  ;;  %v791_v22 = vand.u32 2147483648, %v2078_v28  ;;  %vm405_vm8 = vweird.f32 %v1965_v63 }
 0x148   : > { %v2135_v56 = vpop.eup %1590  ;;  %v821_v36 = vrot.slane %v810_v55, 7  ;;  %v402_v59 = vsub.f32 1.0, %v401_v37 }
 0x149   : > { %v1593_v0 = vpop.eup %1592  ;;  %v781_v5 = vmul.f32 %v2135_v56, %v2078_v28  ;;  %v773_v13 = vsel %vm2152_vm9, %v2072_v7, %v769_v45  ;;  %v848_v7 = vsel %vm828_vm0, 0.0, %v840_v12  ;;  %vm786_vm12 = vweird.f32 %v2135_v56 }
 0x14a   : > { %v2156_v11 = vadd.f32 1.0, %v1593_v0  ;;  %v778_v24 = vsel %vm775_vm10, %v777_v19, %v773_v13  ;;  %891 = vrot.lane.b32.xlu1 %v848_v7, %s1678_s6  ;;  %v1595_v4 = vpop.eup %1594  ;;  %v2201_v44 = vsel %vm828_vm0, 0.0, %v821_v36  ;;  %vm2205_vm13 = vmor %vm785_vm11, %vm786_vm12  ;;  %vm790_vm3 = vcmp.eq.f32.partialorder %v789_v41, 8.507059e+37 }
 0x14b   : > { %v782_v23 = vsub.f32 1.0, %v781_v5  ;;  %v1597_v35 = vpop.eup %1596  ;;  %v2179_v62 = vmul.f32 %v778_v24, %v1973_v2  ;;  %v2181_v29 = vadd.f32 1.0, %v1595_v4  ;;  %954 = vrot.lane.b32.xlu0 %v810_v55, %s1679_s7  ;;  %v792_v45 = vor.u32 1.1754944e-38, %v791_v22 }
 0x14c   : > { %1598 = vrcp.f32 %v2156_v11  ;;  %v2193_v46 = vadd.f32 1.0, %v1597_v35  ;;  %v804_v33 = vand.u32 2147483647, %v2156_v11  ;;  %v806_v53 = vand.u32 2147483648, %v2156_v11 }
 0x14d   : > { %1600 = vpow2.f32 %v1477_v14  ;;  %v783_v30 = vmul.f32 %v2135_v56, %v782_v23  ;;  %v822_v15 = vrot.slane %v2179_v62, 7  ;;  %vm800_vm14 = vweird.f32 %v2156_v11 }
 0x14e   : > { %1602 = vrcp.f32 %v2167_v18  ;;  %vm805_vm5 = vcmp.eq.f32.partialorder %v804_v33, 8.507059e+37  ;;  %v807_v61 = vor.u32 1.1754944e-38, %v806_v53  ;;  %vm667_vm6 = vweird.f32 %v2181_v29 }
 0x14f   : > { %1604 = vpow2.f32 %v1479_v47  ;;  %v784_v2 = vadd.f32 %v2135_v56, %v783_v30  ;;  %871 = vrot.lane.b32.xlu2 %v810_v55, %s1673_s26  ;;  %v2220_v20 = vsel %vm828_vm0, 0.0, %v822_v15  ;;  %v673_v8 = vand.u32 2147483648, %v2181_v29 }
 0x150   : > { %1606 = vrcp.f32 %v2181_v29  ;;  %v403_v1 = vmul.f32 %v2000_v32, %v402_v59  ;;  %vm406_vm10 = vweird.f32 %v2000_v32  ;;  %v411_v24 = vand.u32 2147483648, %v1965_v63 }
 0x151   : > { %v788_v28 = vsel %vm2205_vm13, %v2135_v56, %v784_v2  ;;  %1608 = vrcp.f32 %v2193_v46  ;;  %v409_v7 = vand.u32 2147483647, %v1965_v63  ;;  %vm2269_vm12 = vmor %vm405_vm8, %vm406_vm10  ;;  %v1245_v33 = vand.u32 2147483647, %v2167_v18 }
 0x152   : > { %v1599_v9 = vpop.eup %1598  ;;  %929 = vrot.lane.b32.xlu1 %v2201_v44, %s1680_s8  ;;  %v793_v3 = vsel %vm790_vm3, %v792_v45, %v788_v28  ;;  %v404_v55 = vadd.f32 %v2000_v32, %v403_v1  ;;  %v412_v37 = vor.u32 1.1754944e-38, %v411_v24  ;;  %v904_v24 = vpop.permute.xlu1 %903 }
 0x153   : > { %v796_v39 = vmul.f32 %v1599_v9, %v2156_v11  ;;  %v1601_v42 = vpop.eup %1600  ;;  %vm801_vm15 = vweird.f32 %v1599_v9  ;;  %931 = vrot.lane.b32.xlu0 %v2220_v20, %s1680_s8  ;;  %v671_v11 = vand.u32 2147483647, %v2181_v29  ;;  %v812_v13 = vmul.f32 %v793_v3, %v1997_v27 }
 0x154   : > { %v2196_v51 = vpop.eup %1602  ;;  %v2213_v17 = vadd.f32 1.0, %v1601_v42  ;;  %vm802_vm4 = vmor %vm800_vm14, %vm801_vm15  ;;  %v408_v41 = vsel %vm2269_vm12, %v2000_v32, %v404_v55  ;;  %vm410_vm13 = vcmp.eq.f32.partialorder %v409_v7, 8.507059e+37  ;;  %vm1241_vm15 = vweird.f32 %v2167_v18  ;;  %v870_v55 = vpop.permute.xlu0 %869 }
 0x155   : > { %v797_v49 = vsub.f32 1.0, %v796_v39  ;;  %v1605_v54 = vpop.eup %1604  ;;  %v1237_v10 = vmul.f32 %v2196_v51, %v2167_v18  ;;  %vm672_vm11 = vcmp.eq.f32.partialorder %v671_v11, 8.507059e+37  ;;  %v823_v25 = vrot.slane %v812_v13, 7 }
 0x156   : > { %v1607_v26 = vpop.eup %1606  ;;  %v2226_v0 = vadd.f32 1.0, %v1605_v54  ;;  %1610 = vrcp.f32 %v2213_v17  ;;  %vm1242_vm14 = vweird.f32 %v2196_v51  ;;  %v413_v32 = vsel %vm410_vm13, %v412_v37, %v408_v41 }
 0x157   : > { %v798_v58 = vmul.f32 %v1599_v9, %v797_v49  ;;  %v663_v56 = vmul.f32 %v1607_v26, %v2181_v29  ;;  %vm668_vm7 = vweird.f32 %v1607_v26  ;;  %v2241_v19 = vpop.eup %1608  ;;  %956 = vrot.lane.b32.xlu2 %v2179_v62, %s1679_s7  ;;  %v1238_v47 = vsub.f32 1.0, %v1237_v10  ;;  %vm1243_vm3 = vmor %vm1241_vm15, %vm1242_vm14 }
 0x158   : > { %1612 = vrcp.f32 %v2226_v0  ;;  %vm2252_vm9 = vmor %vm667_vm6, %vm668_vm7  ;;  %v1267_v30 = vmul.f32 %v2241_v19, %v2193_v46  ;;  %v2278_v2 = vsel %vm828_vm0, 0.0, %v823_v25  ;;  %v1247_v49 = vand.u32 2147483648, %v2167_v18 }
 0x159   : > { %v799_v40 = vadd.f32 %v1599_v9, %v798_v58  ;;  %v664_v48 = vsub.f32 1.0, %v663_v56  ;;  %v1239_v39 = vmul.f32 %v2196_v51, %v1238_v47  ;;  %v418_v59 = vmul.f32 %v413_v32, %v1933_v34 }
 0x15a   : > { %873 = vrot.lane.b32.xlu1 %v2179_v62, %s1673_s26  ;;  %v1268_v63 = vsub.f32 1.0, %v1267_v30  ;;  %v1248_v28 = vor.u32 1.1754944e-38, %v1247_v49  ;;  %vm1271_vm6 = vweird.f32 %v2193_v46  ;;  %v1275_v34 = vand.u32 2147483647, %v2193_v46 }
 0x15b   : > { %v803_v5 = vsel %vm802_vm4, %v1599_v9, %v799_v40  ;;  %v665_v14 = vmul.f32 %v1607_v26, %v664_v48  ;;  %875 = vrot.lane.b32.xlu0 %v812_v13, %s1673_s26  ;;  %v1240_v42 = vadd.f32 %v2196_v51, %v1239_v39  ;;  %vm1246_vm4 = vcmp.eq.f32.partialorder %v1245_v33, 8.507059e+37  ;;  %v1005_v39 = vld [vmem:[%s2443_s3] sm:$0xff] }
 0x15c   : > { %v808_v43 = vsel %vm805_vm5, %v807_v61, %v803_v5  ;;  %v2265_v35 = vpop.eup %1610  ;;  %v1269_v53 = vmul.f32 %v2241_v19, %v1268_v63  ;;  %vm1272_vm5 = vweird.f32 %v2241_v19  ;;  %vm1276_vm10 = vcmp.eq.f32.partialorder %v1275_v34, 8.507059e+37  ;;  %v906_v25 = vpop.permute.xlu0 %905 }
 0x15d   : > { %v2236_v12 = vmul.f32 %v808_v43, %v2039_v52  ;;  %v674_v52 = vor.u32 1.1754944e-38, %v673_v8  ;;  %v666_v23 = vadd.f32 %v1607_v26, %v665_v14  ;;  %v1244_v58 = vsel %vm1243_vm3, %v2196_v51, %v1240_v42  ;;  %vm1273_vm7 = vmor %vm1271_vm6, %vm1272_vm5 }
 0x15e   : > { %v2273_v9 = vpop.eup %1612  ;;  %v1249_v18 = vsel %vm1246_vm4, %v1248_v28, %v1244_v58  ;;  %vm1257_vm8 = vweird.f32 %v2265_v35  ;;  %v1292_v8 = vand.u32 2147483648, %v2226_v0  ;;  %v1260_v48 = vand.u32 2147483647, %v2213_v17 }
 0x15f   : > { %815 = vst.msk [vmem:[#allocation3] sm:$0xff] %vm283_vm2, %v2236_v12  ;;  %v670_v4 = vsel %vm2252_vm9, %v1607_v26, %v666_v23  ;;  %933 = vrot.lane.b32.xlu2 %v2278_v2, %s1680_s8  ;;  %v1282_v22 = vmul.f32 %v2273_v9, %v2226_v0  ;;  %v850_v15 = vrot.slane %v2236_v12, 7  ;;  %v1277_v26 = vand.u32 2147483648, %v2193_v46  ;;  %v858_v23 = vpop.permute.xlu2 %857 }
 0x160   : > { %v675_v29 = vsel %vm672_vm11, %v674_v52, %v670_v4  ;;  %v1296_v10 = vmul.f32 %v1249_v18, %v1984_v16  ;;  %vm1287_vm9 = vweird.f32 %v2273_v9  ;;  %vm1256_vm11 = vweird.f32 %v2213_v17  ;;  %v1009_v4 = vld [vmem:[%s2443_s3 + $0x20] sm:$0xf] }
 0x161   : > { %v680_v36 = vmul.f32 %v675_v29, %v2122_v60  ;;  %v1252_v60 = vmul.f32 %v2265_v35, %v2213_v17  ;;  %v1283_v31 = vsub.f32 1.0, %v1282_v22  ;;  %v852_v45 = vsel %vm828_vm0, 0.0, %v850_v15  ;;  %vm2323_vm12 = vmor %vm1256_vm11, %vm1257_vm8  ;;  %1462 = vmatpush.msk.msrb.mxu0 %vm296_vm1, %v1009_v4  ;;  %v1630_v4 = vld [vmem:[%s2444_s4] sm:$0x3f] }
 0x162   : > { %958 = vrot.lane.b32.xlu1 %v812_v13, %s1679_s7  ;;  %v1278_v56 = vor.u32 1.1754944e-38, %v1277_v26  ;;  %v1262_v46 = vand.u32 2147483648, %v2213_v17  ;;  %vm1286_vm13 = vweird.f32 %v2226_v0  ;;  %v1290_v11 = vand.u32 2147483647, %v2226_v0 }
 0x163   : > { %814 = vst.msk [vmem:[#allocation2] sm:$0xff] %vm283_vm2, %v680_v36  ;;  %919 = vrot.lane.b32.xlu0 %v2115_v57, %s1677_s30  ;;  %v1253_v54 = vsub.f32 1.0, %v1252_v60  ;;  %v1270_v57 = vadd.f32 %v2241_v19, %v1269_v53  ;;  %v1284_v51 = vmul.f32 %v2273_v9, %v1283_v31  ;;  %vm1288_vm14 = vmor %vm1286_vm13, %vm1287_vm9  ;;  %vm1261_vm15 = vcmp.eq.f32.partialorder %v1260_v48, 8.507059e+37 }
 0x164   : > { %v1263_v14 = vor.u32 1.1754944e-38, %v1262_v46  ;;  %vm1291_vm3 = vcmp.eq.f32.partialorder %v1290_v11, 8.507059e+37  ;;  %v862_v30 = vpop.permute.xlu0 %861  ;;  %v820_v60 = vrot.slane %v1844_v38, 7  ;;  %vm970_vm1 = vcmask 64512  }
 0x165   : > { %v1254_v40 = vmul.f32 %v2265_v35, %v1253_v54  ;;  %v1274_v61 = vsel %vm1273_vm7, %v2241_v19, %v1270_v57  ;;  %v1285_v5 = vadd.f32 %v2273_v9, %v1284_v51  ;;  %v1293_v19 = vor.u32 1.1754944e-38, %v1292_v8 }
 0x166   : > { %v1279_v43 = vsel %vm1276_vm10, %v1278_v56, %v1274_v61  ;;  %v829_v32 = vsel %vm828_vm0, 0.0, %v820_v60  ;;  %vm975_vm4 = vcmask 97280   ;;  %vm980_vm5 = vcmask 130048  }
 0x167   : > { %907 = vrot.lane.b32.xlu2 %v418_v59, %s1675_s28  ;;  %v1255_v3 = vadd.f32 %v2265_v35, %v1254_v40  ;;  %v1289_v1 = vsel %vm1288_vm14, %v2273_v9, %v1285_v5  ;;  %v1298_v13 = vmul.f32 %v1279_v43, %v2103_v50  ;;  %v902_v47 = vpop.permute.xlu2 %901  ;;  %v1006_v9 = vld [vmem:[%s2443_s3 + $0x8] sm:$0xff]  ;;  %v966_v15 = vsel %vm283_vm2, %v829_v32, %v858_v23 }
 0x168   : > { %v1294_v0 = vsel %vm1291_vm3, %v1293_v19, %v1289_v1  ;;  %v971_v53 = vsel %vm970_vm1, %v966_v15, %v870_v55  ;;  %vm985_vm0 = vcmask 162816   ;;  %vm990_vm6 = vcmask 195584  }
 0x169   : > { %v1299_v52 = vmul.f32 %v1294_v0, %v2147_v6  ;;  %v1008_v6 = vld [vmem:[%s2443_s3 + $0x18] sm:$0xff]  ;;  %vm995_vm7 = vcmask 228352   ;;  %vm1000_vm8 = vcmask 261120   ;;  %vm1010_vm9 = vcmask 293888  }
 0x16a   : > { %935 = vrot.lane.b32.xlu1 %v852_v45, %s1680_s8  ;;  %1038 = vmatpush.msrb.mxu0 %v1008_v6  ;;  %v1060_v6 = vperm.slane %v1630_v4, 5 }
 0x16b   : > { %960 = vrot.lane.b32.xlu0 %v2236_v12, %s1679_s7  ;;  %v1259_v12 = vsel %vm2323_vm12, %v2265_v35, %v1255_v3  ;;  %v1007_v35 = vld [vmem:[%s2443_s3 + $0x10] sm:$0xff]  ;;  %v968_v3 = vsel %vm283_vm2, %v2220_v20, %v862_v30 }
 0x16c   : > { %v1264_v17 = vsel %vm1261_vm15, %v1263_v14, %v1259_v12  ;;  %1039 = vmatpush.msrb.mxu0 %v1007_v35 }
 0x16d   : > { %v1297_v27 = vmul.f32 %v1264_v17, %v2061_v21  ;;  %v860_v21 = vpop.permute.xlu1 %859 }
 0x16e   : > { %1040 = vmatpush.msrb.mxu0 %v1006_v9  ;;  %v967_v38 = vsel %vm283_vm2, %v2201_v44, %v860_v21  ;;  %v1055_v21 = vperm.slane %v1630_v4, 4 }
 0x16f   : > { %948 = vrot.lane.b32.xlu2 %v680_v36, %s1676_s29  ;;  %v943_v50 = vpop.permute.xlu2 %942  ;;  %v947_v36 = vpop.permute.xlu0 %946 }
 0x170   : > { %1041 = vmatpush.msrb.mxu0 %v1005_v39 }
 0x172   : > { %1304 = vrot.lane.b32.xlu1 %v1296_v10, %s1674_s27 }
 0x173   : > { %1308 = vrot.lane.b32.xlu0 %v1298_v13, %s1674_s27 }
 0x175   : > { %v945_v29 = vpop.permute.xlu1 %944 }
 0x177   : > { %1306 = vrot.lane.b32.xlu2 %v1297_v27, %s1674_s27  ;;  %v2342_v7 = vpop.permute.xlu2 %863 }
 0x178   : > { %v969_v20 = vsel %vm283_vm2, %v2278_v2, %v2342_v7 }
 0x17a   : > { %1310 = vrot.lane.b32.xlu1 %v1299_v52, %s1674_s27 }
 0x199   : > { %v916_v62 = vpop.permute.xlu2 %915 }
 0x1a1   : > { %v890_v37 = vpop.permute.xlu2 %889 }
 0x1a9   : > { %v914_v63 = vpop.permute.xlu0 %913  ;;  %v872_v42 = vpop.permute.xlu2 %871 }
 0x1aa   : > { %v972_v59 = vsel %vm970_vm1, %v967_v38, %v872_v42 }
 0x1ac   : > { %v886_v41 = vpop.permute.xlu1 %885 }
 0x1ad   : > { %v976_v54 = vsel %vm975_vm4, %v971_v53, %v886_v41 }
 0x1ae   : > { %v981_v28 = vsel %vm980_vm5, %v976_v54, %v902_v47 }
 0x1af   : > { %v986_v18 = vsel %vm985_vm0, %v981_v28, %v914_v63 }
 0x1b1   : > { %v957_v31 = vpop.permute.xlu2 %956 }
 0x1b4   : > { %v918_v22 = vpop.permute.xlu1 %917 }
 0x1b5   : > { %v888_v49 = vpop.permute.xlu0 %887 }
 0x1b6   : > { %v977_v45 = vsel %vm975_vm4, %v972_v59, %v888_v49 }
 0x1b7   : > { %v982_v26 = vsel %vm980_vm5, %v977_v45, %v904_v24 }
 0x1b8   : > { %v987_v10 = vsel %vm985_vm0, %v982_v26, %v916_v62 }
 0x1b9   : > { %v934_v61 = vpop.permute.xlu2 %933 }
 0x1bc   : > { %v892_v33 = vpop.permute.xlu1 %891 }
 0x1bd   : > { %v955_v58 = vpop.permute.xlu0 %954 }
 0x1c1   : > { %v908_v1 = vpop.permute.xlu2 %907 }
 0x1c4   : > { %v930_v57 = vpop.permute.xlu1 %929 }
 0x1c5   : > { %v991_v40 = vsel %vm990_vm6, %v986_v18, %v930_v57  ;;  %v932_v51 = vpop.permute.xlu0 %931 }
 0x1c6   : > { %v996_v44 = vsel %vm995_vm7, %v991_v40, %v943_v50  ;;  %v992_v56 = vsel %vm990_vm6, %v987_v10, %v932_v51 }
 0x1c7   : > { %v1001_v34 = vsel %vm1000_vm8, %v996_v44, %v955_v58  ;;  %v997_v46 = vsel %vm995_vm7, %v992_v56, %v945_v29 }
 0x1c8   : > { %1463 = vmatmul.msk.f32.vlgmr.msrb.gmra.mxu0 %vm1010_vm9, %v1001_v34  ;;  %v1002_v11 = vsel %vm1000_vm8, %v997_v46, %v957_v31 }
 0x1c9   : > { %v949_v50 = vpop.permute.xlu2 %948 }
 0x1cc   : > { %v874_v5 = vpop.permute.xlu1 %873 }
 0x1cd   : > { %v973_v8 = vsel %vm970_vm1, %v968_v3, %v874_v5  ;;  %v876_v48 = vpop.permute.xlu0 %875 }
 0x1ce   : > { %v978_v43 = vsel %vm975_vm4, %v973_v8, %v890_v37  ;;  %v974_v19 = vsel %vm970_vm1, %v969_v20, %v876_v48 }
 0x1cf   : > { %v983_v16 = vsel %vm980_vm5, %v978_v43, %v906_v25  ;;  %v979_v52 = vsel %vm975_vm4, %v974_v19, %v892_v33 }
 0x1d0   : > { %1464 = vmatmul.msk.f32.gmra.mxu0 %vm1010_vm9, %v1002_v11  ;;  %v988_v12 = vsel %vm985_vm0, %v983_v16, %v918_v22  ;;  %v984_v23 = vsel %vm980_vm5, %v979_v52, %v908_v1 }
 0x1d1   : > { %v993_v13 = vsel %vm990_vm6, %v988_v12, %v934_v61 }
 0x1d2   : > { %v998_v17 = vsel %vm995_vm7, %v993_v13, %v947_v36 }
 0x1d4   : > { %v959_v14 = vpop.permute.xlu1 %958 }
 0x1d5   : > { %v920_v0 = vpop.permute.xlu0 %919  ;;  %v1003_v27 = vsel %vm1000_vm8, %v998_v17, %v959_v14 }
 0x1d6   : > { %v989_v47 = vsel %vm985_vm0, %v984_v23, %v920_v0 }
 0x1d8   : > { %1465 = vmatmul.msk.f32.gmra.mxu0 %vm1010_vm9, %v1003_v27  ;;  %v1307_v27 = vpop.permute.xlu2 %1306 }
 0x1dc   : > { %v936_v55 = vpop.permute.xlu1 %935 }
 0x1dd   : > { %v994_v2 = vsel %vm990_vm6, %v989_v47, %v936_v55  ;;  %v961_v25 = vpop.permute.xlu0 %960 }
 0x1de   : > { %v999_v24 = vsel %vm995_vm7, %v994_v2, %v949_v50 }
 0x1df   : > { %v1004_v7 = vsel %vm1000_vm8, %v999_v24, %v961_v25 }
 0x1e0   : > { %1466 = vmatmul.msk.f32.gmra.mxu0 %vm1010_vm9, %v1004_v7 }
 0x1e4   : > { %v1305_v5 = vpop.permute.xlu1 %1304 }
 0x245   : > { %v1043_v30 = vpop.f32.mrf.mxu0 }
 0x246   : > { %v1056_v35 = vmul.f32 %v1055_v21, %v1043_v30 }
 0x248   : > { %v1061_v62 = vadd.f32 %v1060_v6, %v1056_v35 }
 0x24a   : > { %v1467_v29 = vmul.f32 -1.442695, %v1061_v62 }
 0x24c   : > { %1614 = vpow2.f32 %v1467_v29 }
 0x24d   : > { %v1046_v9 = vpop.f32.mrf.mxu0 }
 0x24e   : > { %v1057_v36 = vmul.f32 %v1055_v21, %v1046_v9 }
 0x250   : > { %v1062_v39 = vadd.f32 %v1060_v6, %v1057_v36 }
 0x252   : > { %v1615_v37 = vpop.eup %1614  ;;  %v1468_v41 = vmul.f32 -1.442695, %v1062_v39 }
 0x253   : > { %v1077_v63 = vadd.f32 1.0, %v1615_v37 }
 0x254   : > { %1616 = vpow2.f32 %v1468_v41 }
 0x255   : > { %1618 = vrcp.f32 %v1077_v63  ;;  %v1049_v60 = vpop.f32.mrf.mxu0  ;;  %v1092_v58 = vand.u32 2147483648, %v1077_v63  ;;  %v1090_v28 = vand.u32 2147483647, %v1077_v63  ;;  %vm1086_vm11 = vweird.f32 %v1077_v63 }
 0x256   : > { %v1058_v22 = vmul.f32 %v1055_v21, %v1049_v60  ;;  %v1311_v60 = vpop.permute.xlu1 %1310 }
 0x257   : > { %v1093_v40 = vor.u32 1.1754944e-38, %v1092_v58  ;;  %vm1091_vm13 = vcmp.eq.f32.partialorder %v1090_v28, 8.507059e+37 }
 0x258   : > { %v2405_v42 = vadd.f32 %v1060_v6, %v1058_v22 }
 0x25a   : > { %v1617_v32 = vpop.eup %1616  ;;  %v1469_v49 = vmul.f32 -1.442695, %v2405_v42 }
 0x25b   : > { %v1619_v15 = vpop.eup %1618  ;;  %v1078_v33 = vadd.f32 1.0, %v1617_v32 }
 0x25c   : > { %v1082_v53 = vmul.f32 %v1619_v15, %v1077_v63  ;;  %1620 = vpow2.f32 %v1469_v49  ;;  %vm1087_vm10 = vweird.f32 %v1619_v15 }
 0x25d   : > { %1622 = vrcp.f32 %v1078_v33  ;;  %v1052_v31 = vpop.f32.mrf.mxu0  ;;  %vm1088_vm12 = vmor %vm1086_vm11, %vm1087_vm10  ;;  %v1107_v46 = vand.u32 2147483648, %v1078_v33  ;;  %v1105_v16 = vand.u32 2147483647, %v1078_v33  ;;  %vm1101_vm15 = vweird.f32 %v1078_v33 }
 0x25e   : > { %v1083_v54 = vsub.f32 1.0, %v1082_v53  ;;  %v1059_v38 = vmul.f32 %v1055_v21, %v1052_v31 }
 0x25f   : > { %v1108_v12 = vor.u32 1.1754944e-38, %v1107_v46  ;;  %vm1106_vm4 = vcmp.eq.f32.partialorder %v1105_v16, 8.507059e+37 }
 0x260   : > { %v1084_v59 = vmul.f32 %v1619_v15, %v1083_v54  ;;  %v2408_v45 = vadd.f32 %v1060_v6, %v1059_v38  ;;  %v1309_v6 = vpop.permute.xlu0 %1308 }
 0x262   : > { %v1621_v57 = vpop.eup %1620  ;;  %v1085_v18 = vadd.f32 %v1619_v15, %v1084_v59  ;;  %v1470_v51 = vmul.f32 -1.442695, %v2408_v45 }
 0x263   : > { %v1623_v26 = vpop.eup %1622  ;;  %v1079_v44 = vadd.f32 1.0, %v1621_v57 }
 0x264   : > { %v1089_v34 = vsel %vm1088_vm12, %v1619_v15, %v1085_v18  ;;  %v1097_v10 = vmul.f32 %v1623_v26, %v1078_v33  ;;  %vm1102_vm14 = vweird.f32 %v1623_v26 }
 0x265   : > { %v1094_v61 = vsel %vm1091_vm13, %v1093_v40, %v1089_v34  ;;  %1624 = vrcp.f32 %v1079_v44  ;;  %vm1103_vm3 = vmor %vm1101_vm15, %vm1102_vm14  ;;  %v1122_v52 = vand.u32 2147483648, %v1079_v44  ;;  %v1120_v55 = vand.u32 2147483647, %v1079_v44 }
 0x266   : > { %v1141_v56 = vmul.f32 %v1094_v61, %v1061_v62  ;;  %v1098_v3 = vsub.f32 1.0, %v1097_v10  ;;  %1626 = vpow2.f32 %v1470_v51  ;;  %vm1116_vm0 = vweird.f32 %v1079_v44 }
 0x267   : > { %v1123_v2 = vor.u32 1.1754944e-38, %v1122_v52  ;;  %vm1121_vm7 = vcmp.eq.f32.partialorder %v1120_v55, 8.507059e+37 }
 0x268   : > { %v1316_v8 = vsel %vm283_vm2, %v1141_v56, %v1305_v5  ;;  %v1099_v43 = vmul.f32 %v1623_v26, %v1098_v3 }
 0x269   : > { %1320 = vst.msk [vmem:[%s1753_s13] sm:$0xff] %vm970_vm1, %v1316_v8 }
 0x26a   : > { %v1100_v48 = vadd.f32 %v1623_v26, %v1099_v43 }
 0x26b   : > { %v1625_v11 = vpop.eup %1624 }
 0x26c   : > { %v1627_v1 = vpop.eup %1626  ;;  %v1104_v13 = vsel %vm1103_vm3, %v1623_v26, %v1100_v48  ;;  %v1112_v20 = vmul.f32 %v1625_v11, %v1079_v44  ;;  %vm1117_vm5 = vweird.f32 %v1625_v11 }
 0x26d   : > { %v1109_v14 = vsel %vm1106_vm4, %v1108_v12, %v1104_v13  ;;  %v1080_v19 = vadd.f32 1.0, %v1627_v1  ;;  %vm1118_vm6 = vmor %vm1116_vm0, %vm1117_vm5 }
 0x26e   : > { %v1142_v17 = vmul.f32 %v1109_v14, %v1062_v39  ;;  %v1113_v0 = vsub.f32 1.0, %v1112_v20 }
 0x26f   : > { %1628 = vrcp.f32 %v1080_v19  ;;  %v1137_v62 = vand.u32 2147483648, %v1080_v19  ;;  %v1135_v9 = vand.u32 2147483647, %v1080_v19  ;;  %vm1131_vm9 = vweird.f32 %v1080_v19 }
 0x270   : > { %v1317_v23 = vsel %vm283_vm2, %v1142_v17, %v1307_v27  ;;  %v1114_v47 = vmul.f32 %v1625_v11, %v1113_v0 }
 0x271   : > { %1321 = vst.msk [vmem:[%s1753_s13 + $0x8] sm:$0xff] %vm970_vm1, %v1317_v23  ;;  %v1138_v39 = vor.u32 1.1754944e-38, %v1137_v62  ;;  %vm1136_vm11 = vcmp.eq.f32.partialorder %v1135_v9, 8.507059e+37 }
 0x272   : > { %v1115_v50 = vadd.f32 %v1625_v11, %v1114_v47 }
 0x274   : > { %v1119_v24 = vsel %vm1118_vm6, %v1625_v11, %v1115_v50 }
 0x275   : > { %v1629_v25 = vpop.eup %1628  ;;  %v1124_v7 = vsel %vm1121_vm7, %v1123_v2, %v1119_v24 }
 0x276   : > { %v1143_v4 = vmul.f32 %v1124_v7, %v2405_v42  ;;  %v1127_v21 = vmul.f32 %v1629_v25, %v1080_v19  ;;  %vm1132_vm8 = vweird.f32 %v1629_v25 }
 0x277   : > { %vm1133_vm10 = vmor %vm1131_vm9, %vm1132_vm8 }
 0x278   : > { %v1318_v30 = vsel %vm283_vm2, %v1143_v4, %v1309_v6  ;;  %v1128_v35 = vsub.f32 1.0, %v1127_v21 }
 0x279   : > { %1322 = vst.msk [vmem:[%s1753_s13 + $0x10] sm:$0xff] %vm970_vm1, %v1318_v30 }
 0x27a   : > { %v1129_v29 = vmul.f32 %v1629_v25, %v1128_v35 }
 0x27c   : > { %v1130_v36 = vadd.f32 %v1629_v25, %v1129_v29 }
 0x27e   : > { %v1134_v37 = vsel %vm1133_vm10, %v1629_v25, %v1130_v36 }
 0x27f   : > { %v1139_v41 = vsel %vm1136_vm11, %v1138_v39, %v1134_v37 }
 0x280   : > { %v1144_v63 = vmul.f32 %v1139_v41, %v2408_v45 }
 0x282   : > { %v1319_v22 = vsel %vm283_vm2, %v1144_v63, %v1311_v60 }
 0x283   : > { %1323 = vst.msk [vmem:[%s1753_s13 + $0x18] sm:$0xff] %vm970_vm1, %v1319_v22 }
 0x284 PF: > { %s15_s22 = sadd.s32 1, %s1669_s22   ;;  %s2478_s18 = smov %s1661_s20 }
 0x285   : > { %p12_p9 = scmp.ge.s32.totalorder %s15_s22, 6   ;;  %s2479_s19 = smov %s1665_s21 }
 0x286   : > { %s2480_s20 = smov %s2483_s23  ;;  %s2481_s21 = smov %s2487_s24 }
 0x287   :  { %14 = sbr.rel (!%p12_p9) target bundleno = 3 (0x3), region = 74 }

</bundles_post_ra>
